<compile_context>
chip_gen: v7x
topology: tpu7x:2x2x1
jax: 0.10.0
libtpu: 0.0.40
codegen_flags: <defaults>
</compile_context>

<pallas_src>
import functools

import jax
import jax.numpy as jnp
from jax import lax
from jax.experimental import pallas as pl
from jax.experimental.pallas import tpu as pltpu


def _kuramoto_kernel(z_ref, kt_ref, omega_ref, out_ref, *,
                     dt, steps, inv2N, mm_dtype, batch):
    # z_ref / out_ref: (2B, Np) f32 VMEM -- rows [0:B) = Re(z), [B:2B) = Im(z),
    #                  lane-padded with zeros.  out_ref doubles as the state buffer.
    # kt_ref:          (Np, Np) mm_dtype VMEM -- K^T (zero-padded), resident across steps.
    # omega_ref:       (1,) f32 SMEM scalar.
    B = batch
    out_ref[...] = z_ref[...]                     # state lives in the resident output block
    KT = kt_ref[...]                              # (Np, Np)
    omega = omega_ref[0]
    c = 1.0 + dt * omega                          # folds t2 + identity: z + dt*omega*z
    dt_inv2N = dt * inv2N                         # folds dt into the (1/2N)*(K@z) terms

    def one_step():
        S = out_ref[...]                                              # (2B, Np) f32
        # One fused MXU matmul for K@Re(z) and K@Im(z) of every batch row.
        KZ = jnp.dot(S.astype(mm_dtype), KT,
                     preferred_element_type=jnp.float32)              # (2B, Np) f32
        zr = S[0:B, :]
        zi = S[B:2 * B, :]
        Qr = dt_inv2N * KZ[0:B, :]                                    # dt/(2N) * Re(K@z)
        Qi = dt_inv2N * KZ[B:2 * B, :]                                # dt/(2N) * Im(K@z)
        # z^2 = a + i*b
        a = zr * zr - zi * zi
        b = 2.0 * zr * zi
        # z_new = (1 + dt*omega)*z + Q - conj(Q)*z^2   (== z + dt*(t1+t2+t3))
        zr_new = c * zr + Qr * (1.0 - a) - Qi * b
        zi_new = c * zi + Qi * (1.0 + a) - Qr * b
        # projection |z| <= 0.999 : one EUP rsqrt, no select; padded lanes stay 0.
        n2 = zr_new * zr_new + zi_new * zi_new
        scale = jnp.minimum(1.0, 0.999 * lax.rsqrt(n2))
        out_ref[0:B, :] = zr_new * scale
        out_ref[B:2 * B, :] = zi_new * scale

    if steps <= 32:
        # full static unroll: cross-iteration visibility for the LLO scheduler
        for _ in range(steps):
            one_step()
    else:
        @pl.loop(0, steps)
        def _(_step):
            one_step()

    # final per-oscillator norm clamp (same rule as the per-step projection)
    S = out_ref[...]
    zr = S[0:B, :]
    zi = S[B:2 * B, :]
    n2 = zr * zr + zi * zi
    scale = jnp.minimum(1.0, 0.999 * lax.rsqrt(n2))
    out_ref[0:B, :] = zr * scale
    out_ref[B:2 * B, :] = zi * scale


def _vmem_capacity_bytes():
    # Generation-aware VMEM capacity (v5e/v6e: 128 MiB, v7x: 64 MiB per TC).
    try:
        info = pltpu.get_tpu_info()
        cap = getattr(info, "vmem_capacity_bytes", None)
        if cap:
            return int(cap)
    except Exception:
        pass
    return 64 * 1024 * 1024   # conservative fallback (v7x per-TensorCore VMEM)


def hyperbolic_kuramoto_pallas(z, K, omega, dt, steps, matmul_dtype=jnp.bfloat16):
    """z: (N, 2) or (B, N, 2) f32, K: (N, N) f32, omega: scalar f32.

    Returns an array of the same leading shape as `z` ((N, 2) or (B, N, 2)).
    B independent systems sharing K are stacked into the matmul M dimension.
    """
    z = jnp.asarray(z, jnp.float32)
    squeeze = (z.ndim == 2)
    if squeeze:
        z = z[None]                                     # (1, N, 2)
    B, N, _ = z.shape
    assert K.shape == (N, N), "K must be (N, N)"
    Np = ((N + 127) // 128) * 128                       # lane-dense padding
    inv2N = 1.0 / (2.0 * N)                             # ORIGINAL N (padding-safe)

    # State slab (2B, Np): rows [0:B) = Re, [B:2B) = Im, zero-padded lanes.
    z2 = jnp.zeros((2 * B, Np), jnp.float32)
    z2 = z2.at[:B, :N].set(z[..., 0]).at[B:, :N].set(z[..., 1])

    # K@v computed as lane-dense row-vector product  v(2B,Np) @ K^T(Np,Np).
    KT = jnp.zeros((Np, Np), matmul_dtype).at[:N, :N].set(
        jnp.transpose(K).astype(matmul_dtype))
    omega_arr = jnp.reshape(jnp.asarray(omega, jnp.float32), (1,))

    kt_bytes = Np * Np * jnp.dtype(matmul_dtype).itemsize
    state_bytes = 4 * (2 * B) * Np * 4                  # in + out + temporaries headroom
    cap = _vmem_capacity_bytes()
    need = kt_bytes + state_bytes + (4 << 20)
    if need > cap - (2 << 20):
        # TODO(synk): stream K^T from HBM (memory_space=pl.ANY + inner emit_pipeline
        #             over column blocks) instead of failing for very large N.
        raise ValueError(
            f"K^T ({kt_bytes >> 20} MiB) does not fit the VMEM budget "
            f"({cap >> 20} MiB) on this TPU generation.")
    vmem_limit = int(min(cap - (4 << 20), max(32 << 20, need)))

    out = pl.pallas_call(
        functools.partial(_kuramoto_kernel, dt=float(dt), steps=int(steps),
                          inv2N=inv2N, mm_dtype=matmul_dtype, batch=B),
        out_shape=jax.ShapeDtypeStruct((2 * B, Np), jnp.float32),
        in_specs=[
            pl.BlockSpec(memory_space=pltpu.MemorySpace.VMEM),   # z state (2B, Np)
            pl.BlockSpec(memory_space=pltpu.MemorySpace.VMEM),   # K^T (Np, Np)
            pl.BlockSpec(memory_space=pltpu.MemorySpace.SMEM),   # omega (1,)
        ],
        out_specs=pl.BlockSpec(memory_space=pltpu.MemorySpace.VMEM),
        compiler_params=pltpu.CompilerParams(vmem_limit_bytes=vmem_limit),
    )(z2, KT, omega_arr)

    res = jnp.stack([out[:B, :N], out[B:, :N]], axis=-1)    # (B, N, 2)
    return res[0] if squeeze else res


def hyperbolic_kuramoto_ref(z, K, omega, dt, steps):
    """Pure-JAX reference mirroring the PyTorch complex implementation."""
    N = K.shape[0]
    z_c = z[:, 0] + 1j * z[:, 1]
    Kc = K.astype(jnp.complex64)
    for _ in range(steps):
        S = jnp.dot(Kc, jnp.conj(z_c), precision=lax.Precision.HIGHEST)
        t1 = -(1.0 / (2 * N)) * S * z_c**2
        t2 = omega * z_c
        t3 = (1.0 / (2 * N)) * jnp.dot(Kc, z_c, precision=lax.Precision.HIGHEST)
        z_c = z_c + dt * (t1 + t2 + t3)
        absz = jnp.abs(z_c)
        z_c = jnp.where(absz >= 0.999, z_c / jnp.maximum(absz, 1e-30) * 0.999, z_c)
    z_f = jnp.stack([jnp.real(z_c), jnp.imag(z_c)], -1)
    norms = jnp.linalg.norm(z_f, axis=1, keepdims=True)
    return jnp.where(norms >= 0.999, z_f / jnp.maximum(norms, 1e-30) * 0.999, z_f)


if __name__ == "__main__":
    N = 64
    dt = 0.05
    steps = 10

    key = jax.random.PRNGKey(0)
    k1, k2, k3 = jax.random.split(key, 3)
    # Parameters (deterministic, mirroring __init__: K ~ randn(N,N)*0.1, omega = 0.1)
    K = jax.random.normal(k1, (N, N), dtype=jnp.float32) * 0.1
    omega = jnp.float32(0.1)
    # Input state z: (N, 2)
    z = jax.random.normal(k2, (N, 2), dtype=jnp.float32) * 0.5

    out = hyperbolic_kuramoto_pallas(z, K, omega, dt, steps)
    out = jax.block_until_ready(out)
    ref = hyperbolic_kuramoto_ref(z, K, omega, dt, steps)
    assert out.shape == (N, 2) and out.dtype == jnp.float32
    assert jnp.allclose(out, ref, atol=2e-3, rtol=2e-3), "mismatch vs reference"

    # Batched systems sharing K: stacked into the matmul M dimension (one dot per step).
    zb = jax.random.normal(k3, (2, N, 2), dtype=jnp.float32) * 0.5
    outb = jax.block_until_ready(hyperbolic_kuramoto_pallas(zb, K, omega, dt, steps))
    refb = jnp.stack([hyperbolic_kuramoto_ref(zb[i], K, omega, dt, steps)
                      for i in range(2)])
    assert outb.shape == (2, N, 2)
    assert jnp.allclose(outb, refb, atol=2e-3, rtol=2e-3), "batched mismatch vs reference"

    print("KERNEL_OK")
</pallas_src>

<mosaic_0001>
module attributes {stable_mosaic.version = 11 : i64} {
  func.func @_kuramoto_kernel(%arg0: memref<2x128xf32, #tpu.memory_space<vmem>>, %arg1: memref<128x128xbf16, #tpu.memory_space<vmem>>, %arg2: memref<1xf32, #tpu.memory_space<smem>>, %arg3: memref<2x128xf32, #tpu.memory_space<vmem>>) attributes {dimension_semantics = [], scalar_prefetch = 0 : i64, scratch_operands = 0 : i64, tpu.core_type = #tpu.core_type<tc>} {
    %c0 = arith.constant 0 : index
    %c0_0 = arith.constant 0 : index
    %0 = vector.load %arg0[%c0, %c0_0] : memref<2x128xf32, #tpu.memory_space<vmem>>, vector<2x128xf32>
    %c0_1 = arith.constant 0 : index
    %c0_2 = arith.constant 0 : index
    %1 = vector.load %arg3[%c0_1, %c0_2] : memref<2x128xf32, #tpu.memory_space<vmem>>, vector<2x128xf32>
    tpu.vector_store %arg3[%c0_1, %c0_2], %0 {strides = array<i32>} : memref<2x128xf32, #tpu.memory_space<vmem>>, vector<2x128xf32>,
    %c0_3 = arith.constant 0 : index
    %c0_4 = arith.constant 0 : index
    %2 = vector.load %arg1[%c0_3, %c0_4] : memref<128x128xbf16, #tpu.memory_space<vmem>>, vector<128x128xbf16>
    %c0_5 = arith.constant 0 : index
    %3 = memref.load %arg2[%c0_5] : memref<1xf32, #tpu.memory_space<smem>>
    %cst = arith.constant 5.000000e-02 : f32
    %4 = arith.mulf %cst, %3 : f32
    %cst_6 = arith.constant 1.000000e+00 : f32
    %5 = arith.addf %cst_6, %4 : f32
    %c0_7 = arith.constant 0 : index
    %c0_8 = arith.constant 0 : index
    %6 = vector.load %arg3[%c0_7, %c0_8] : memref<2x128xf32, #tpu.memory_space<vmem>>, vector<2x128xf32>
    %7 = arith.truncf %6 : vector<2x128xf32> to vector<2x128xbf16>
    %cst_9 = arith.constant dense<0.000000e+00> : vector<2x128xf32>
    %8 = tpu.matmul %7, %2, %cst_9 {dimension_numbers = #tpu.dot_dimension_numbers<[1], [0], [0], [1], [0, 0, 1, 1], [], []>} : vector<2x128xbf16>, vector<128x128xbf16>, vector<2x128xf32> -> vector<2x128xf32>
    %9 = vector.extract_strided_slice %6 {offsets = [0, 0], sizes = [1, 128], strides = [1, 1]} : vector<2x128xf32> to vector<1x128xf32>
    %10 = vector.extract_strided_slice %6 {offsets = [1, 0], sizes = [1, 128], strides = [1, 1]} : vector<2x128xf32> to vector<1x128xf32>
    %11 = vector.extract_strided_slice %8 {offsets = [0, 0], sizes = [1, 128], strides = [1, 1]} : vector<2x128xf32> to vector<1x128xf32>
    %cst_10 = arith.constant 3.906250e-04 : f32
    %12 = vector.broadcast %cst_10 : f32 to vector<1x128xf32>
    %13 = arith.mulf %12, %11 : vector<1x128xf32>
    %14 = vector.extract_strided_slice %8 {offsets = [1, 0], sizes = [1, 128], strides = [1, 1]} : vector<2x128xf32> to vector<1x128xf32>
    %cst_11 = arith.constant 3.906250e-04 : f32
    %15 = vector.broadcast %cst_11 : f32 to vector<1x128xf32>
    %16 = arith.mulf %15, %14 : vector<1x128xf32>
    %17 = arith.mulf %9, %9 : vector<1x128xf32>
    %18 = arith.mulf %10, %10 : vector<1x128xf32>
    %19 = arith.subf %17, %18 : vector<1x128xf32>
    %cst_12 = arith.constant 2.000000e+00 : f32
    %20 = vector.broadcast %cst_12 : f32 to vector<1x128xf32>
    %21 = arith.mulf %20, %9 : vector<1x128xf32>
    %22 = arith.mulf %21, %10 : vector<1x128xf32>
    %23 = vector.broadcast %5 : f32 to vector<1x128xf32>
    %24 = arith.mulf %23, %9 : vector<1x128xf32>
    %cst_13 = arith.constant 1.000000e+00 : f32
    %25 = vector.broadcast %cst_13 : f32 to vector<1x128xf32>
    %26 = arith.subf %25, %19 : vector<1x128xf32>
    %27 = arith.mulf %13, %26 : vector<1x128xf32>
    %28 = arith.addf %24, %27 : vector<1x128xf32>
    %29 = arith.mulf %16, %22 : vector<1x128xf32>
    %30 = arith.subf %28, %29 : vector<1x128xf32>
    %31 = vector.broadcast %5 : f32 to vector<1x128xf32>
    %32 = arith.mulf %31, %10 : vector<1x128xf32>
    %cst_14 = arith.constant 1.000000e+00 : f32
    %33 = vector.broadcast %cst_14 : f32 to vector<1x128xf32>
    %34 = arith.addf %33, %19 : vector<1x128xf32>
    %35 = arith.mulf %16, %34 : vector<1x128xf32>
    %36 = arith.addf %32, %35 : vector<1x128xf32>
    %37 = arith.mulf %13, %22 : vector<1x128xf32>
    %38 = arith.subf %36, %37 : vector<1x128xf32>
    %39 = arith.mulf %30, %30 : vector<1x128xf32>
    %40 = arith.mulf %38, %38 : vector<1x128xf32>
    %41 = arith.addf %39, %40 : vector<1x128xf32>
    %42 = math.rsqrt %41 : vector<1x128xf32>
    %cst_15 = arith.constant 9.990000e-01 : f32
    %43 = vector.broadcast %cst_15 : f32 to vector<1x128xf32>
    %44 = arith.mulf %43, %42 : vector<1x128xf32>
    %cst_16 = arith.constant 1.000000e+00 : f32
    %45 = vector.broadcast %cst_16 : f32 to vector<1x128xf32>
    %46 = arith.minimumf %45, %44 : vector<1x128xf32>
    %47 = arith.mulf %30, %46 : vector<1x128xf32>
    %c0_17 = arith.constant 0 : index
    %c0_18 = arith.constant 0 : index
    %48 = vector.load %arg3[%c0_17, %c0_18] : memref<2x128xf32, #tpu.memory_space<vmem>>, vector<1x128xf32>
    tpu.vector_store %arg3[%c0_17, %c0_18], %47 {strides = array<i32>} : memref<2x128xf32, #tpu.memory_space<vmem>>, vector<1x128xf32>,
    %49 = arith.mulf %38, %46 : vector<1x128xf32>
    %c1 = arith.constant 1 : index
    %c0_19 = arith.constant 0 : index
    %50 = vector.load %arg3[%c1, %c0_19] : memref<2x128xf32, #tpu.memory_space<vmem>>, vector<1x128xf32>
    tpu.vector_store %arg3[%c1, %c0_19], %49 {strides = array<i32>} : memref<2x128xf32, #tpu.memory_space<vmem>>, vector<1x128xf32>,
    %c0_20 = arith.constant 0 : index
    %c0_21 = arith.constant 0 : index
    %51 = vector.load %arg3[%c0_20, %c0_21] : memref<2x128xf32, #tpu.memory_space<vmem>>, vector<2x128xf32>
    %52 = arith.truncf %51 : vector<2x128xf32> to vector<2x128xbf16>
    %cst_22 = arith.constant dense<0.000000e+00> : vector<2x128xf32>
    %53 = tpu.matmul %52, %2, %cst_22 {dimension_numbers = #tpu.dot_dimension_numbers<[1], [0], [0], [1], [0, 0, 1, 1], [], []>} : vector<2x128xbf16>, vector<128x128xbf16>, vector<2x128xf32> -> vector<2x128xf32>
    %54 = vector.extract_strided_slice %51 {offsets = [0, 0], sizes = [1, 128], strides = [1, 1]} : vector<2x128xf32> to vector<1x128xf32>
    %55 = vector.extract_strided_slice %51 {offsets = [1, 0], sizes = [1, 128], strides = [1, 1]} : vector<2x128xf32> to vector<1x128xf32>
    %56 = vector.extract_strided_slice %53 {offsets = [0, 0], sizes = [1, 128], strides = [1, 1]} : vector<2x128xf32> to vector<1x128xf32>
    %cst_23 = arith.constant 3.906250e-04 : f32
    %57 = vector.broadcast %cst_23 : f32 to vector<1x128xf32>
    %58 = arith.mulf %57, %56 : vector<1x128xf32>
    %59 = vector.extract_strided_slice %53 {offsets = [1, 0], sizes = [1, 128], strides = [1, 1]} : vector<2x128xf32> to vector<1x128xf32>
    %cst_24 = arith.constant 3.906250e-04 : f32
    %60 = vector.broadcast %cst_24 : f32 to vector<1x128xf32>
    %61 = arith.mulf %60, %59 : vector<1x128xf32>
    %62 = arith.mulf %54, %54 : vector<1x128xf32>
    %63 = arith.mulf %55, %55 : vector<1x128xf32>
    %64 = arith.subf %62, %63 : vector<1x128xf32>
    %cst_25 = arith.constant 2.000000e+00 : f32
    %65 = vector.broadcast %cst_25 : f32 to vector<1x128xf32>
    %66 = arith.mulf %65, %54 : vector<1x128xf32>
    %67 = arith.mulf %66, %55 : vector<1x128xf32>
    %68 = vector.broadcast %5 : f32 to vector<1x128xf32>
    %69 = arith.mulf %68, %54 : vector<1x128xf32>
    %cst_26 = arith.constant 1.000000e+00 : f32
    %70 = vector.broadcast %cst_26 : f32 to vector<1x128xf32>
    %71 = arith.subf %70, %64 : vector<1x128xf32>
    %72 = arith.mulf %58, %71 : vector<1x128xf32>
    %73 = arith.addf %69, %72 : vector<1x128xf32>
    %74 = arith.mulf %61, %67 : vector<1x128xf32>
    %75 = arith.subf %73, %74 : vector<1x128xf32>
    %76 = vector.broadcast %5 : f32 to vector<1x128xf32>
    %77 = arith.mulf %76, %55 : vector<1x128xf32>
    %cst_27 = arith.constant 1.000000e+00 : f32
    %78 = vector.broadcast %cst_27 : f32 to vector<1x128xf32>
    %79 = arith.addf %78, %64 : vector<1x128xf32>
    %80 = arith.mulf %61, %79 : vector<1x128xf32>
    %81 = arith.addf %77, %80 : vector<1x128xf32>
    %82 = arith.mulf %58, %67 : vector<1x128xf32>
    %83 = arith.subf %81, %82 : vector<1x128xf32>
    %84 = arith.mulf %75, %75 : vector<1x128xf32>
    %85 = arith.mulf %83, %83 : vector<1x128xf32>
    %86 = arith.addf %84, %85 : vector<1x128xf32>
    %87 = math.rsqrt %86 : vector<1x128xf32>
    %cst_28 = arith.constant 9.990000e-01 : f32
    %88 = vector.broadcast %cst_28 : f32 to vector<1x128xf32>
    %89 = arith.mulf %88, %87 : vector<1x128xf32>
    %cst_29 = arith.constant 1.000000e+00 : f32
    %90 = vector.broadcast %cst_29 : f32 to vector<1x128xf32>
    %91 = arith.minimumf %90, %89 : vector<1x128xf32>
    %92 = arith.mulf %75, %91 : vector<1x128xf32>
    %c0_30 = arith.constant 0 : index
    %c0_31 = arith.constant 0 : index
    %93 = vector.load %arg3[%c0_30, %c0_31] : memref<2x128xf32, #tpu.memory_space<vmem>>, vector<1x128xf32>
    tpu.vector_store %arg3[%c0_30, %c0_31], %92 {strides = array<i32>} : memref<2x128xf32, #tpu.memory_space<vmem>>, vector<1x128xf32>,
    %94 = arith.mulf %83, %91 : vector<1x128xf32>
    %c1_32 = arith.constant 1 : index
    %c0_33 = arith.constant 0 : index
    %95 = vector.load %arg3[%c1_32, %c0_33] : memref<2x128xf32, #tpu.memory_space<vmem>>, vector<1x128xf32>
    tpu.vector_store %arg3[%c1_32, %c0_33], %94 {strides = array<i32>} : memref<2x128xf32, #tpu.memory_space<vmem>>, vector<1x128xf32>,
    %c0_34 = arith.constant 0 : index
    %c0_35 = arith.constant 0 : index
    %96 = vector.load %arg3[%c0_34, %c0_35] : memref<2x128xf32, #tpu.memory_space<vmem>>, vector<2x128xf32>
    %97 = arith.truncf %96 : vector<2x128xf32> to vector<2x128xbf16>
    %cst_36 = arith.constant dense<0.000000e+00> : vector<2x128xf32>
    %98 = tpu.matmul %97, %2, %cst_36 {dimension_numbers = #tpu.dot_dimension_numbers<[1], [0], [0], [1], [0, 0, 1, 1], [], []>} : vector<2x128xbf16>, vector<128x128xbf16>, vector<2x128xf32> -> vector<2x128xf32>
    %99 = vector.extract_strided_slice %96 {offsets = [0, 0], sizes = [1, 128], strides = [1, 1]} : vector<2x128xf32> to vector<1x128xf32>
    %100 = vector.extract_strided_slice %96 {offsets = [1, 0], sizes = [1, 128], strides = [1, 1]} : vector<2x128xf32> to vector<1x128xf32>
    %101 = vector.extract_strided_slice %98 {offsets = [0, 0], sizes = [1, 128], strides = [1, 1]} : vector<2x128xf32> to vector<1x128xf32>
    %cst_37 = arith.constant 3.906250e-04 : f32
    %102 = vector.broadcast %cst_37 : f32 to vector<1x128xf32>
    %103 = arith.mulf %102, %101 : vector<1x128xf32>
    %104 = vector.extract_strided_slice %98 {offsets = [1, 0], sizes = [1, 128], strides = [1, 1]} : vector<2x128xf32> to vector<1x128xf32>
    %cst_38 = arith.constant 3.906250e-04 : f32
    %105 = vector.broadcast %cst_38 : f32 to vector<1x128xf32>
    %106 = arith.mulf %105, %104 : vector<1x128xf32>
    %107 = arith.mulf %99, %99 : vector<1x128xf32>
    %108 = arith.mulf %100, %100 : vector<1x128xf32>
    %109 = arith.subf %107, %108 : vector<1x128xf32>
    %cst_39 = arith.constant 2.000000e+00 : f32
    %110 = vector.broadcast %cst_39 : f32 to vector<1x128xf32>
    %111 = arith.mulf %110, %99 : vector<1x128xf32>
    %112 = arith.mulf %111, %100 : vector<1x128xf32>
    %113 = vector.broadcast %5 : f32 to vector<1x128xf32>
    %114 = arith.mulf %113, %99 : vector<1x128xf32>
    %cst_40 = arith.constant 1.000000e+00 : f32
    %115 = vector.broadcast %cst_40 : f32 to vector<1x128xf32>
    %116 = arith.subf %115, %109 : vector<1x128xf32>
    %117 = arith.mulf %103, %116 : vector<1x128xf32>
    %118 = arith.addf %114, %117 : vector<1x128xf32>
    %119 = arith.mulf %106, %112 : vector<1x128xf32>
    %120 = arith.subf %118, %119 : vector<1x128xf32>
    %121 = vector.broadcast %5 : f32 to vector<1x128xf32>
    %122 = arith.mulf %121, %100 : vector<1x128xf32>
    %cst_41 = arith.constant 1.000000e+00 : f32
    %123 = vector.broadcast %cst_41 : f32 to vector<1x128xf32>
    %124 = arith.addf %123, %109 : vector<1x128xf32>
    %125 = arith.mulf %106, %124 : vector<1x128xf32>
    %126 = arith.addf %122, %125 : vector<1x128xf32>
    %127 = arith.mulf %103, %112 : vector<1x128xf32>
    %128 = arith.subf %126, %127 : vector<1x128xf32>
    %129 = arith.mulf %120, %120 : vector<1x128xf32>
    %130 = arith.mulf %128, %128 : vector<1x128xf32>
    %131 = arith.addf %129, %130 : vector<1x128xf32>
    %132 = math.rsqrt %131 : vector<1x128xf32>
    %cst_42 = arith.constant 9.990000e-01 : f32
    %133 = vector.broadcast %cst_42 : f32 to vector<1x128xf32>
    %134 = arith.mulf %133, %132 : vector<1x128xf32>
    %cst_43 = arith.constant 1.000000e+00 : f32
    %135 = vector.broadcast %cst_43 : f32 to vector<1x128xf32>
    %136 = arith.minimumf %135, %134 : vector<1x128xf32>
    %137 = arith.mulf %120, %136 : vector<1x128xf32>
    %c0_44 = arith.constant 0 : index
    %c0_45 = arith.constant 0 : index
    %138 = vector.load %arg3[%c0_44, %c0_45] : memref<2x128xf32, #tpu.memory_space<vmem>>, vector<1x128xf32>
    tpu.vector_store %arg3[%c0_44, %c0_45], %137 {strides = array<i32>} : memref<2x128xf32, #tpu.memory_space<vmem>>, vector<1x128xf32>,
    %139 = arith.mulf %128, %136 : vector<1x128xf32>
    %c1_46 = arith.constant 1 : index
    %c0_47 = arith.constant 0 : index
    %140 = vector.load %arg3[%c1_46, %c0_47] : memref<2x128xf32, #tpu.memory_space<vmem>>, vector<1x128xf32>
    tpu.vector_store %arg3[%c1_46, %c0_47], %139 {strides = array<i32>} : memref<2x128xf32, #tpu.memory_space<vmem>>, vector<1x128xf32>,
    %c0_48 = arith.constant 0 : index
    %c0_49 = arith.constant 0 : index
    %141 = vector.load %arg3[%c0_48, %c0_49] : memref<2x128xf32, #tpu.memory_space<vmem>>, vector<2x128xf32>
    %142 = arith.truncf %141 : vector<2x128xf32> to vector<2x128xbf16>
    %cst_50 = arith.constant dense<0.000000e+00> : vector<2x128xf32>
    %143 = tpu.matmul %142, %2, %cst_50 {dimension_numbers = #tpu.dot_dimension_numbers<[1], [0], [0], [1], [0, 0, 1, 1], [], []>} : vector<2x128xbf16>, vector<128x128xbf16>, vector<2x128xf32> -> vector<2x128xf32>
    %144 = vector.extract_strided_slice %141 {offsets = [0, 0], sizes = [1, 128], strides = [1, 1]} : vector<2x128xf32> to vector<1x128xf32>
    %145 = vector.extract_strided_slice %141 {offsets = [1, 0], sizes = [1, 128], strides = [1, 1]} : vector<2x128xf32> to vector<1x128xf32>
    %146 = vector.extract_strided_slice %143 {offsets = [0, 0], sizes = [1, 128], strides = [1, 1]} : vector<2x128xf32> to vector<1x128xf32>
    %cst_51 = arith.constant 3.906250e-04 : f32
    %147 = vector.broadcast %cst_51 : f32 to vector<1x128xf32>
    %148 = arith.mulf %147, %146 : vector<1x128xf32>
    %149 = vector.extract_strided_slice %143 {offsets = [1, 0], sizes = [1, 128], strides = [1, 1]} : vector<2x128xf32> to vector<1x128xf32>
    %cst_52 = arith.constant 3.906250e-04 : f32
    %150 = vector.broadcast %cst_52 : f32 to vector<1x128xf32>
    %151 = arith.mulf %150, %149 : vector<1x128xf32>
    %152 = arith.mulf %144, %144 : vector<1x128xf32>
    %153 = arith.mulf %145, %145 : vector<1x128xf32>
    %154 = arith.subf %152, %153 : vector<1x128xf32>
    %cst_53 = arith.constant 2.000000e+00 : f32
    %155 = vector.broadcast %cst_53 : f32 to vector<1x128xf32>
    %156 = arith.mulf %155, %144 : vector<1x128xf32>
    %157 = arith.mulf %156, %145 : vector<1x128xf32>
    %158 = vector.broadcast %5 : f32 to vector<1x128xf32>
    %159 = arith.mulf %158, %144 : vector<1x128xf32>
    %cst_54 = arith.constant 1.000000e+00 : f32
    %160 = vector.broadcast %cst_54 : f32 to vector<1x128xf32>
    %161 = arith.subf %160, %154 : vector<1x128xf32>
    %162 = arith.mulf %148, %161 : vector<1x128xf32>
    %163 = arith.addf %159, %162 : vector<1x128xf32>
    %164 = arith.mulf %151, %157 : vector<1x128xf32>
    %165 = arith.subf %163, %164 : vector<1x128xf32>
    %166 = vector.broadcast %5 : f32 to vector<1x128xf32>
    %167 = arith.mulf %166, %145 : vector<1x128xf32>
    %cst_55 = arith.constant 1.000000e+00 : f32
    %168 = vector.broadcast %cst_55 : f32 to vector<1x128xf32>
    %169 = arith.addf %168, %154 : vector<1x128xf32>
    %170 = arith.mulf %151, %169 : vector<1x128xf32>
    %171 = arith.addf %167, %170 : vector<1x128xf32>
    %172 = arith.mulf %148, %157 : vector<1x128xf32>
    %173 = arith.subf %171, %172 : vector<1x128xf32>
    %174 = arith.mulf %165, %165 : vector<1x128xf32>
    %175 = arith.mulf %173, %173 : vector<1x128xf32>
    %176 = arith.addf %174, %175 : vector<1x128xf32>
    %177 = math.rsqrt %176 : vector<1x128xf32>
    %cst_56 = arith.constant 9.990000e-01 : f32
    %178 = vector.broadcast %cst_56 : f32 to vector<1x128xf32>
    %179 = arith.mulf %178, %177 : vector<1x128xf32>
    %cst_57 = arith.constant 1.000000e+00 : f32
    %180 = vector.broadcast %cst_57 : f32 to vector<1x128xf32>
    %181 = arith.minimumf %180, %179 : vector<1x128xf32>
    %182 = arith.mulf %165, %181 : vector<1x128xf32>
    %c0_58 = arith.constant 0 : index
    %c0_59 = arith.constant 0 : index
    %183 = vector.load %arg3[%c0_58, %c0_59] : memref<2x128xf32, #tpu.memory_space<vmem>>, vector<1x128xf32>
    tpu.vector_store %arg3[%c0_58, %c0_59], %182 {strides = array<i32>} : memref<2x128xf32, #tpu.memory_space<vmem>>, vector<1x128xf32>,
    %184 = arith.mulf %173, %181 : vector<1x128xf32>
    %c1_60 = arith.constant 1 : index
    %c0_61 = arith.constant 0 : index
    %185 = vector.load %arg3[%c1_60, %c0_61] : memref<2x128xf32, #tpu.memory_space<vmem>>, vector<1x128xf32>
    tpu.vector_store %arg3[%c1_60, %c0_61], %184 {strides = array<i32>} : memref<2x128xf32, #tpu.memory_space<vmem>>, vector<1x128xf32>,
    %c0_62 = arith.constant 0 : index
    %c0_63 = arith.constant 0 : index
    %186 = vector.load %arg3[%c0_62, %c0_63] : memref<2x128xf32, #tpu.memory_space<vmem>>, vector<2x128xf32>
    %187 = arith.truncf %186 : vector<2x128xf32> to vector<2x128xbf16>
    %cst_64 = arith.constant dense<0.000000e+00> : vector<2x128xf32>
    %188 = tpu.matmul %187, %2, %cst_64 {dimension_numbers = #tpu.dot_dimension_numbers<[1], [0], [0], [1], [0, 0, 1, 1], [], []>} : vector<2x128xbf16>, vector<128x128xbf16>, vector<2x128xf32> -> vector<2x128xf32>
    %189 = vector.extract_strided_slice %186 {offsets = [0, 0], sizes = [1, 128], strides = [1, 1]} : vector<2x128xf32> to vector<1x128xf32>
    %190 = vector.extract_strided_slice %186 {offsets = [1, 0], sizes = [1, 128], strides = [1, 1]} : vector<2x128xf32> to vector<1x128xf32>
    %191 = vector.extract_strided_slice %188 {offsets = [0, 0], sizes = [1, 128], strides = [1, 1]} : vector<2x128xf32> to vector<1x128xf32>
    %cst_65 = arith.constant 3.906250e-04 : f32
    %192 = vector.broadcast %cst_65 : f32 to vector<1x128xf32>
    %193 = arith.mulf %192, %191 : vector<1x128xf32>
    %194 = vector.extract_strided_slice %188 {offsets = [1, 0], sizes = [1, 128], strides = [1, 1]} : vector<2x128xf32> to vector<1x128xf32>
    %cst_66 = arith.constant 3.906250e-04 : f32
    %195 = vector.broadcast %cst_66 : f32 to vector<1x128xf32>
    %196 = arith.mulf %195, %194 : vector<1x128xf32>
    %197 = arith.mulf %189, %189 : vector<1x128xf32>
    %198 = arith.mulf %190, %190 : vector<1x128xf32>
    %199 = arith.subf %197, %198 : vector<1x128xf32>
    %cst_67 = arith.constant 2.000000e+00 : f32
    %200 = vector.broadcast %cst_67 : f32 to vector<1x128xf32>
    %201 = arith.mulf %200, %189 : vector<1x128xf32>
    %202 = arith.mulf %201, %190 : vector<1x128xf32>
    %203 = vector.broadcast %5 : f32 to vector<1x128xf32>
    %204 = arith.mulf %203, %189 : vector<1x128xf32>
    %cst_68 = arith.constant 1.000000e+00 : f32
    %205 = vector.broadcast %cst_68 : f32 to vector<1x128xf32>
    %206 = arith.subf %205, %199 : vector<1x128xf32>
    %207 = arith.mulf %193, %206 : vector<1x128xf32>
    %208 = arith.addf %204, %207 : vector<1x128xf32>
    %209 = arith.mulf %196, %202 : vector<1x128xf32>
    %210 = arith.subf %208, %209 : vector<1x128xf32>
    %211 = vector.broadcast %5 : f32 to vector<1x128xf32>
    %212 = arith.mulf %211, %190 : vector<1x128xf32>
    %cst_69 = arith.constant 1.000000e+00 : f32
    %213 = vector.broadcast %cst_69 : f32 to vector<1x128xf32>
    %214 = arith.addf %213, %199 : vector<1x128xf32>
    %215 = arith.mulf %196, %214 : vector<1x128xf32>
    %216 = arith.addf %212, %215 : vector<1x128xf32>
    %217 = arith.mulf %193, %202 : vector<1x128xf32>
    %218 = arith.subf %216, %217 : vector<1x128xf32>
    %219 = arith.mulf %210, %210 : vector<1x128xf32>
    %220 = arith.mulf %218, %218 : vector<1x128xf32>
    %221 = arith.addf %219, %220 : vector<1x128xf32>
    %222 = math.rsqrt %221 : vector<1x128xf32>
    %cst_70 = arith.constant 9.990000e-01 : f32
    %223 = vector.broadcast %cst_70 : f32 to vector<1x128xf32>
    %224 = arith.mulf %223, %222 : vector<1x128xf32>
    %cst_71 = arith.constant 1.000000e+00 : f32
    %225 = vector.broadcast %cst_71 : f32 to vector<1x128xf32>
    %226 = arith.minimumf %225, %224 : vector<1x128xf32>
    %227 = arith.mulf %210, %226 : vector<1x128xf32>
    %c0_72 = arith.constant 0 : index
    %c0_73 = arith.constant 0 : index
    %228 = vector.load %arg3[%c0_72, %c0_73] : memref<2x128xf32, #tpu.memory_space<vmem>>, vector<1x128xf32>
    tpu.vector_store %arg3[%c0_72, %c0_73], %227 {strides = array<i32>} : memref<2x128xf32, #tpu.memory_space<vmem>>, vector<1x128xf32>,
    %229 = arith.mulf %218, %226 : vector<1x128xf32>
    %c1_74 = arith.constant 1 : index
    %c0_75 = arith.constant 0 : index
    %230 = vector.load %arg3[%c1_74, %c0_75] : memref<2x128xf32, #tpu.memory_space<vmem>>, vector<1x128xf32>
    tpu.vector_store %arg3[%c1_74, %c0_75], %229 {strides = array<i32>} : memref<2x128xf32, #tpu.memory_space<vmem>>, vector<1x128xf32>,
    %c0_76 = arith.constant 0 : index
    %c0_77 = arith.constant 0 : index
    %231 = vector.load %arg3[%c0_76, %c0_77] : memref<2x128xf32, #tpu.memory_space<vmem>>, vector<2x128xf32>
    %232 = arith.truncf %231 : vector<2x128xf32> to vector<2x128xbf16>
    %cst_78 = arith.constant dense<0.000000e+00> : vector<2x128xf32>
    %233 = tpu.matmul %232, %2, %cst_78 {dimension_numbers = #tpu.dot_dimension_numbers<[1], [0], [0], [1], [0, 0, 1, 1], [], []>} : vector<2x128xbf16>, vector<128x128xbf16>, vector<2x128xf32> -> vector<2x128xf32>
    %234 = vector.extract_strided_slice %231 {offsets = [0, 0], sizes = [1, 128], strides = [1, 1]} : vector<2x128xf32> to vector<1x128xf32>
    %235 = vector.extract_strided_slice %231 {offsets = [1, 0], sizes = [1, 128], strides = [1, 1]} : vector<2x128xf32> to vector<1x128xf32>
    %236 = vector.extract_strided_slice %233 {offsets = [0, 0], sizes = [1, 128], strides = [1, 1]} : vector<2x128xf32> to vector<1x128xf32>
    %cst_79 = arith.constant 3.906250e-04 : f32
    %237 = vector.broadcast %cst_79 : f32 to vector<1x128xf32>
    %238 = arith.mulf %237, %236 : vector<1x128xf32>
    %239 = vector.extract_strided_slice %233 {offsets = [1, 0], sizes = [1, 128], strides = [1, 1]} : vector<2x128xf32> to vector<1x128xf32>
    %cst_80 = arith.constant 3.906250e-04 : f32
    %240 = vector.broadcast %cst_80 : f32 to vector<1x128xf32>
    %241 = arith.mulf %240, %239 : vector<1x128xf32>
    %242 = arith.mulf %234, %234 : vector<1x128xf32>
    %243 = arith.mulf %235, %235 : vector<1x128xf32>
    %244 = arith.subf %242, %243 : vector<1x128xf32>
    %cst_81 = arith.constant 2.000000e+00 : f32
    %245 = vector.broadcast %cst_81 : f32 to vector<1x128xf32>
    %246 = arith.mulf %245, %234 : vector<1x128xf32>
    %247 = arith.mulf %246, %235 : vector<1x128xf32>
    %248 = vector.broadcast %5 : f32 to vector<1x128xf32>
    %249 = arith.mulf %248, %234 : vector<1x128xf32>
    %cst_82 = arith.constant 1.000000e+00 : f32
    %250 = vector.broadcast %cst_82 : f32 to vector<1x128xf32>
    %251 = arith.subf %250, %244 : vector<1x128xf32>
    %252 = arith.mulf %238, %251 : vector<1x128xf32>
    %253 = arith.addf %249, %252 : vector<1x128xf32>
    %254 = arith.mulf %241, %247 : vector<1x128xf32>
    %255 = arith.subf %253, %254 : vector<1x128xf32>
    %256 = vector.broadcast %5 : f32 to vector<1x128xf32>
    %257 = arith.mulf %256, %235 : vector<1x128xf32>
    %cst_83 = arith.constant 1.000000e+00 : f32
    %258 = vector.broadcast %cst_83 : f32 to vector<1x128xf32>
    %259 = arith.addf %258, %244 : vector<1x128xf32>
    %260 = arith.mulf %241, %259 : vector<1x128xf32>
    %261 = arith.addf %257, %260 : vector<1x128xf32>
    %262 = arith.mulf %238, %247 : vector<1x128xf32>
    %263 = arith.subf %261, %262 : vector<1x128xf32>
    %264 = arith.mulf %255, %255 : vector<1x128xf32>
    %265 = arith.mulf %263, %263 : vector<1x128xf32>
    %266 = arith.addf %264, %265 : vector<1x128xf32>
    %267 = math.rsqrt %266 : vector<1x128xf32>
    %cst_84 = arith.constant 9.990000e-01 : f32
    %268 = vector.broadcast %cst_84 : f32 to vector<1x128xf32>
    %269 = arith.mulf %268, %267 : vector<1x128xf32>
    %cst_85 = arith.constant 1.000000e+00 : f32
    %270 = vector.broadcast %cst_85 : f32 to vector<1x128xf32>
    %271 = arith.minimumf %270, %269 : vector<1x128xf32>
    %272 = arith.mulf %255, %271 : vector<1x128xf32>
    %c0_86 = arith.constant 0 : index
    %c0_87 = arith.constant 0 : index
    %273 = vector.load %arg3[%c0_86, %c0_87] : memref<2x128xf32, #tpu.memory_space<vmem>>, vector<1x128xf32>
    tpu.vector_store %arg3[%c0_86, %c0_87], %272 {strides = array<i32>} : memref<2x128xf32, #tpu.memory_space<vmem>>, vector<1x128xf32>,
    %274 = arith.mulf %263, %271 : vector<1x128xf32>
    %c1_88 = arith.constant 1 : index
    %c0_89 = arith.constant 0 : index
    %275 = vector.load %arg3[%c1_88, %c0_89] : memref<2x128xf32, #tpu.memory_space<vmem>>, vector<1x128xf32>
    tpu.vector_store %arg3[%c1_88, %c0_89], %274 {strides = array<i32>} : memref<2x128xf32, #tpu.memory_space<vmem>>, vector<1x128xf32>,
    %c0_90 = arith.constant 0 : index
    %c0_91 = arith.constant 0 : index
    %276 = vector.load %arg3[%c0_90, %c0_91] : memref<2x128xf32, #tpu.memory_space<vmem>>, vector<2x128xf32>
    %277 = arith.truncf %276 : vector<2x128xf32> to vector<2x128xbf16>
    %cst_92 = arith.constant dense<0.000000e+00> : vector<2x128xf32>
    %278 = tpu.matmul %277, %2, %cst_92 {dimension_numbers = #tpu.dot_dimension_numbers<[1], [0], [0], [1], [0, 0, 1, 1], [], []>} : vector<2x128xbf16>, vector<128x128xbf16>, vector<2x128xf32> -> vector<2x128xf32>
    %279 = vector.extract_strided_slice %276 {offsets = [0, 0], sizes = [1, 128], strides = [1, 1]} : vector<2x128xf32> to vector<1x128xf32>
    %280 = vector.extract_strided_slice %276 {offsets = [1, 0], sizes = [1, 128], strides = [1, 1]} : vector<2x128xf32> to vector<1x128xf32>
    %281 = vector.extract_strided_slice %278 {offsets = [0, 0], sizes = [1, 128], strides = [1, 1]} : vector<2x128xf32> to vector<1x128xf32>
    %cst_93 = arith.constant 3.906250e-04 : f32
    %282 = vector.broadcast %cst_93 : f32 to vector<1x128xf32>
    %283 = arith.mulf %282, %281 : vector<1x128xf32>
    %284 = vector.extract_strided_slice %278 {offsets = [1, 0], sizes = [1, 128], strides = [1, 1]} : vector<2x128xf32> to vector<1x128xf32>
    %cst_94 = arith.constant 3.906250e-04 : f32
    %285 = vector.broadcast %cst_94 : f32 to vector<1x128xf32>
    %286 = arith.mulf %285, %284 : vector<1x128xf32>
    %287 = arith.mulf %279, %279 : vector<1x128xf32>
    %288 = arith.mulf %280, %280 : vector<1x128xf32>
    %289 = arith.subf %287, %288 : vector<1x128xf32>
    %cst_95 = arith.constant 2.000000e+00 : f32
    %290 = vector.broadcast %cst_95 : f32 to vector<1x128xf32>
    %291 = arith.mulf %290, %279 : vector<1x128xf32>
    %292 = arith.mulf %291, %280 : vector<1x128xf32>
    %293 = vector.broadcast %5 : f32 to vector<1x128xf32>
    %294 = arith.mulf %293, %279 : vector<1x128xf32>
    %cst_96 = arith.constant 1.000000e+00 : f32
    %295 = vector.broadcast %cst_96 : f32 to vector<1x128xf32>
    %296 = arith.subf %295, %289 : vector<1x128xf32>
    %297 = arith.mulf %283, %296 : vector<1x128xf32>
    %298 = arith.addf %294, %297 : vector<1x128xf32>
    %299 = arith.mulf %286, %292 : vector<1x128xf32>
    %300 = arith.subf %298, %299 : vector<1x128xf32>
    %301 = vector.broadcast %5 : f32 to vector<1x128xf32>
    %302 = arith.mulf %301, %280 : vector<1x128xf32>
    %cst_97 = arith.constant 1.000000e+00 : f32
    %303 = vector.broadcast %cst_97 : f32 to vector<1x128xf32>
    %304 = arith.addf %303, %289 : vector<1x128xf32>
    %305 = arith.mulf %286, %304 : vector<1x128xf32>
    %306 = arith.addf %302, %305 : vector<1x128xf32>
    %307 = arith.mulf %283, %292 : vector<1x128xf32>
    %308 = arith.subf %306, %307 : vector<1x128xf32>
    %309 = arith.mulf %300, %300 : vector<1x128xf32>
    %310 = arith.mulf %308, %308 : vector<1x128xf32>
    %311 = arith.addf %309, %310 : vector<1x128xf32>
    %312 = math.rsqrt %311 : vector<1x128xf32>
    %cst_98 = arith.constant 9.990000e-01 : f32
    %313 = vector.broadcast %cst_98 : f32 to vector<1x128xf32>
    %314 = arith.mulf %313, %312 : vector<1x128xf32>
    %cst_99 = arith.constant 1.000000e+00 : f32
    %315 = vector.broadcast %cst_99 : f32 to vector<1x128xf32>
    %316 = arith.minimumf %315, %314 : vector<1x128xf32>
    %317 = arith.mulf %300, %316 : vector<1x128xf32>
    %c0_100 = arith.constant 0 : index
    %c0_101 = arith.constant 0 : index
    %318 = vector.load %arg3[%c0_100, %c0_101] : memref<2x128xf32, #tpu.memory_space<vmem>>, vector<1x128xf32>
    tpu.vector_store %arg3[%c0_100, %c0_101], %317 {strides = array<i32>} : memref<2x128xf32, #tpu.memory_space<vmem>>, vector<1x128xf32>,
    %319 = arith.mulf %308, %316 : vector<1x128xf32>
    %c1_102 = arith.constant 1 : index
    %c0_103 = arith.constant 0 : index
    %320 = vector.load %arg3[%c1_102, %c0_103] : memref<2x128xf32, #tpu.memory_space<vmem>>, vector<1x128xf32>
    tpu.vector_store %arg3[%c1_102, %c0_103], %319 {strides = array<i32>} : memref<2x128xf32, #tpu.memory_space<vmem>>, vector<1x128xf32>,
    %c0_104 = arith.constant 0 : index
    %c0_105 = arith.constant 0 : index
    %321 = vector.load %arg3[%c0_104, %c0_105] : memref<2x128xf32, #tpu.memory_space<vmem>>, vector<2x128xf32>
    %322 = arith.truncf %321 : vector<2x128xf32> to vector<2x128xbf16>
    %cst_106 = arith.constant dense<0.000000e+00> : vector<2x128xf32>
    %323 = tpu.matmul %322, %2, %cst_106 {dimension_numbers = #tpu.dot_dimension_numbers<[1], [0], [0], [1], [0, 0, 1, 1], [], []>} : vector<2x128xbf16>, vector<128x128xbf16>, vector<2x128xf32> -> vector<2x128xf32>
    %324 = vector.extract_strided_slice %321 {offsets = [0, 0], sizes = [1, 128], strides = [1, 1]} : vector<2x128xf32> to vector<1x128xf32>
    %325 = vector.extract_strided_slice %321 {offsets = [1, 0], sizes = [1, 128], strides = [1, 1]} : vector<2x128xf32> to vector<1x128xf32>
    %326 = vector.extract_strided_slice %323 {offsets = [0, 0], sizes = [1, 128], strides = [1, 1]} : vector<2x128xf32> to vector<1x128xf32>
    %cst_107 = arith.constant 3.906250e-04 : f32
    %327 = vector.broadcast %cst_107 : f32 to vector<1x128xf32>
    %328 = arith.mulf %327, %326 : vector<1x128xf32>
    %329 = vector.extract_strided_slice %323 {offsets = [1, 0], sizes = [1, 128], strides = [1, 1]} : vector<2x128xf32> to vector<1x128xf32>
    %cst_108 = arith.constant 3.906250e-04 : f32
    %330 = vector.broadcast %cst_108 : f32 to vector<1x128xf32>
    %331 = arith.mulf %330, %329 : vector<1x128xf32>
    %332 = arith.mulf %324, %324 : vector<1x128xf32>
    %333 = arith.mulf %325, %325 : vector<1x128xf32>
    %334 = arith.subf %332, %333 : vector<1x128xf32>
    %cst_109 = arith.constant 2.000000e+00 : f32
    %335 = vector.broadcast %cst_109 : f32 to vector<1x128xf32>
    %336 = arith.mulf %335, %324 : vector<1x128xf32>
    %337 = arith.mulf %336, %325 : vector<1x128xf32>
    %338 = vector.broadcast %5 : f32 to vector<1x128xf32>
    %339 = arith.mulf %338, %324 : vector<1x128xf32>
    %cst_110 = arith.constant 1.000000e+00 : f32
    %340 = vector.broadcast %cst_110 : f32 to vector<1x128xf32>
    %341 = arith.subf %340, %334 : vector<1x128xf32>
    %342 = arith.mulf %328, %341 : vector<1x128xf32>
    %343 = arith.addf %339, %342 : vector<1x128xf32>
    %344 = arith.mulf %331, %337 : vector<1x128xf32>
    %345 = arith.subf %343, %344 : vector<1x128xf32>
    %346 = vector.broadcast %5 : f32 to vector<1x128xf32>
    %347 = arith.mulf %346, %325 : vector<1x128xf32>
    %cst_111 = arith.constant 1.000000e+00 : f32
    %348 = vector.broadcast %cst_111 : f32 to vector<1x128xf32>
    %349 = arith.addf %348, %334 : vector<1x128xf32>
    %350 = arith.mulf %331, %349 : vector<1x128xf32>
    %351 = arith.addf %347, %350 : vector<1x128xf32>
    %352 = arith.mulf %328, %337 : vector<1x128xf32>
    %353 = arith.subf %351, %352 : vector<1x128xf32>
    %354 = arith.mulf %345, %345 : vector<1x128xf32>
    %355 = arith.mulf %353, %353 : vector<1x128xf32>
    %356 = arith.addf %354, %355 : vector<1x128xf32>
    %357 = math.rsqrt %356 : vector<1x128xf32>
    %cst_112 = arith.constant 9.990000e-01 : f32
    %358 = vector.broadcast %cst_112 : f32 to vector<1x128xf32>
    %359 = arith.mulf %358, %357 : vector<1x128xf32>
    %cst_113 = arith.constant 1.000000e+00 : f32
    %360 = vector.broadcast %cst_113 : f32 to vector<1x128xf32>
    %361 = arith.minimumf %360, %359 : vector<1x128xf32>
    %362 = arith.mulf %345, %361 : vector<1x128xf32>
    %c0_114 = arith.constant 0 : index
    %c0_115 = arith.constant 0 : index
    %363 = vector.load %arg3[%c0_114, %c0_115] : memref<2x128xf32, #tpu.memory_space<vmem>>, vector<1x128xf32>
    tpu.vector_store %arg3[%c0_114, %c0_115], %362 {strides = array<i32>} : memref<2x128xf32, #tpu.memory_space<vmem>>, vector<1x128xf32>,
    %364 = arith.mulf %353, %361 : vector<1x128xf32>
    %c1_116 = arith.constant 1 : index
    %c0_117 = arith.constant 0 : index
    %365 = vector.load %arg3[%c1_116, %c0_117] : memref<2x128xf32, #tpu.memory_space<vmem>>, vector<1x128xf32>
    tpu.vector_store %arg3[%c1_116, %c0_117], %364 {strides = array<i32>} : memref<2x128xf32, #tpu.memory_space<vmem>>, vector<1x128xf32>,
    %c0_118 = arith.constant 0 : index
    %c0_119 = arith.constant 0 : index
    %366 = vector.load %arg3[%c0_118, %c0_119] : memref<2x128xf32, #tpu.memory_space<vmem>>, vector<2x128xf32>
    %367 = arith.truncf %366 : vector<2x128xf32> to vector<2x128xbf16>
    %cst_120 = arith.constant dense<0.000000e+00> : vector<2x128xf32>
    %368 = tpu.matmul %367, %2, %cst_120 {dimension_numbers = #tpu.dot_dimension_numbers<[1], [0], [0], [1], [0, 0, 1, 1], [], []>} : vector<2x128xbf16>, vector<128x128xbf16>, vector<2x128xf32> -> vector<2x128xf32>
    %369 = vector.extract_strided_slice %366 {offsets = [0, 0], sizes = [1, 128], strides = [1, 1]} : vector<2x128xf32> to vector<1x128xf32>
    %370 = vector.extract_strided_slice %366 {offsets = [1, 0], sizes = [1, 128], strides = [1, 1]} : vector<2x128xf32> to vector<1x128xf32>
    %371 = vector.extract_strided_slice %368 {offsets = [0, 0], sizes = [1, 128], strides = [1, 1]} : vector<2x128xf32> to vector<1x128xf32>
    %cst_121 = arith.constant 3.906250e-04 : f32
    %372 = vector.broadcast %cst_121 : f32 to vector<1x128xf32>
    %373 = arith.mulf %372, %371 : vector<1x128xf32>
    %374 = vector.extract_strided_slice %368 {offsets = [1, 0], sizes = [1, 128], strides = [1, 1]} : vector<2x128xf32> to vector<1x128xf32>
    %cst_122 = arith.constant 3.906250e-04 : f32
    %375 = vector.broadcast %cst_122 : f32 to vector<1x128xf32>
    %376 = arith.mulf %375, %374 : vector<1x128xf32>
    %377 = arith.mulf %369, %369 : vector<1x128xf32>
    %378 = arith.mulf %370, %370 : vector<1x128xf32>
    %379 = arith.subf %377, %378 : vector<1x128xf32>
    %cst_123 = arith.constant 2.000000e+00 : f32
    %380 = vector.broadcast %cst_123 : f32 to vector<1x128xf32>
    %381 = arith.mulf %380, %369 : vector<1x128xf32>
    %382 = arith.mulf %381, %370 : vector<1x128xf32>
    %383 = vector.broadcast %5 : f32 to vector<1x128xf32>
    %384 = arith.mulf %383, %369 : vector<1x128xf32>
    %cst_124 = arith.constant 1.000000e+00 : f32
    %385 = vector.broadcast %cst_124 : f32 to vector<1x128xf32>
    %386 = arith.subf %385, %379 : vector<1x128xf32>
    %387 = arith.mulf %373, %386 : vector<1x128xf32>
    %388 = arith.addf %384, %387 : vector<1x128xf32>
    %389 = arith.mulf %376, %382 : vector<1x128xf32>
    %390 = arith.subf %388, %389 : vector<1x128xf32>
    %391 = vector.broadcast %5 : f32 to vector<1x128xf32>
    %392 = arith.mulf %391, %370 : vector<1x128xf32>
    %cst_125 = arith.constant 1.000000e+00 : f32
    %393 = vector.broadcast %cst_125 : f32 to vector<1x128xf32>
    %394 = arith.addf %393, %379 : vector<1x128xf32>
    %395 = arith.mulf %376, %394 : vector<1x128xf32>
    %396 = arith.addf %392, %395 : vector<1x128xf32>
    %397 = arith.mulf %373, %382 : vector<1x128xf32>
    %398 = arith.subf %396, %397 : vector<1x128xf32>
    %399 = arith.mulf %390, %390 : vector<1x128xf32>
    %400 = arith.mulf %398, %398 : vector<1x128xf32>
    %401 = arith.addf %399, %400 : vector<1x128xf32>
    %402 = math.rsqrt %401 : vector<1x128xf32>
    %cst_126 = arith.constant 9.990000e-01 : f32
    %403 = vector.broadcast %cst_126 : f32 to vector<1x128xf32>
    %404 = arith.mulf %403, %402 : vector<1x128xf32>
    %cst_127 = arith.constant 1.000000e+00 : f32
    %405 = vector.broadcast %cst_127 : f32 to vector<1x128xf32>
    %406 = arith.minimumf %405, %404 : vector<1x128xf32>
    %407 = arith.mulf %390, %406 : vector<1x128xf32>
    %c0_128 = arith.constant 0 : index
    %c0_129 = arith.constant 0 : index
    %408 = vector.load %arg3[%c0_128, %c0_129] : memref<2x128xf32, #tpu.memory_space<vmem>>, vector<1x128xf32>
    tpu.vector_store %arg3[%c0_128, %c0_129], %407 {strides = array<i32>} : memref<2x128xf32, #tpu.memory_space<vmem>>, vector<1x128xf32>,
    %409 = arith.mulf %398, %406 : vector<1x128xf32>
    %c1_130 = arith.constant 1 : index
    %c0_131 = arith.constant 0 : index
    %410 = vector.load %arg3[%c1_130, %c0_131] : memref<2x128xf32, #tpu.memory_space<vmem>>, vector<1x128xf32>
    tpu.vector_store %arg3[%c1_130, %c0_131], %409 {strides = array<i32>} : memref<2x128xf32, #tpu.memory_space<vmem>>, vector<1x128xf32>,
    %c0_132 = arith.constant 0 : index
    %c0_133 = arith.constant 0 : index
    %411 = vector.load %arg3[%c0_132, %c0_133] : memref<2x128xf32, #tpu.memory_space<vmem>>, vector<2x128xf32>
    %412 = arith.truncf %411 : vector<2x128xf32> to vector<2x128xbf16>
    %cst_134 = arith.constant dense<0.000000e+00> : vector<2x128xf32>
    %413 = tpu.matmul %412, %2, %cst_134 {dimension_numbers = #tpu.dot_dimension_numbers<[1], [0], [0], [1], [0, 0, 1, 1], [], []>} : vector<2x128xbf16>, vector<128x128xbf16>, vector<2x128xf32> -> vector<2x128xf32>
    %414 = vector.extract_strided_slice %411 {offsets = [0, 0], sizes = [1, 128], strides = [1, 1]} : vector<2x128xf32> to vector<1x128xf32>
    %415 = vector.extract_strided_slice %411 {offsets = [1, 0], sizes = [1, 128], strides = [1, 1]} : vector<2x128xf32> to vector<1x128xf32>
    %416 = vector.extract_strided_slice %413 {offsets = [0, 0], sizes = [1, 128], strides = [1, 1]} : vector<2x128xf32> to vector<1x128xf32>
    %cst_135 = arith.constant 3.906250e-04 : f32
    %417 = vector.broadcast %cst_135 : f32 to vector<1x128xf32>
    %418 = arith.mulf %417, %416 : vector<1x128xf32>
    %419 = vector.extract_strided_slice %413 {offsets = [1, 0], sizes = [1, 128], strides = [1, 1]} : vector<2x128xf32> to vector<1x128xf32>
    %cst_136 = arith.constant 3.906250e-04 : f32
    %420 = vector.broadcast %cst_136 : f32 to vector<1x128xf32>
    %421 = arith.mulf %420, %419 : vector<1x128xf32>
    %422 = arith.mulf %414, %414 : vector<1x128xf32>
    %423 = arith.mulf %415, %415 : vector<1x128xf32>
    %424 = arith.subf %422, %423 : vector<1x128xf32>
    %cst_137 = arith.constant 2.000000e+00 : f32
    %425 = vector.broadcast %cst_137 : f32 to vector<1x128xf32>
    %426 = arith.mulf %425, %414 : vector<1x128xf32>
    %427 = arith.mulf %426, %415 : vector<1x128xf32>
    %428 = vector.broadcast %5 : f32 to vector<1x128xf32>
    %429 = arith.mulf %428, %414 : vector<1x128xf32>
    %cst_138 = arith.constant 1.000000e+00 : f32
    %430 = vector.broadcast %cst_138 : f32 to vector<1x128xf32>
    %431 = arith.subf %430, %424 : vector<1x128xf32>
    %432 = arith.mulf %418, %431 : vector<1x128xf32>
    %433 = arith.addf %429, %432 : vector<1x128xf32>
    %434 = arith.mulf %421, %427 : vector<1x128xf32>
    %435 = arith.subf %433, %434 : vector<1x128xf32>
    %436 = vector.broadcast %5 : f32 to vector<1x128xf32>
    %437 = arith.mulf %436, %415 : vector<1x128xf32>
    %cst_139 = arith.constant 1.000000e+00 : f32
    %438 = vector.broadcast %cst_139 : f32 to vector<1x128xf32>
    %439 = arith.addf %438, %424 : vector<1x128xf32>
    %440 = arith.mulf %421, %439 : vector<1x128xf32>
    %441 = arith.addf %437, %440 : vector<1x128xf32>
    %442 = arith.mulf %418, %427 : vector<1x128xf32>
    %443 = arith.subf %441, %442 : vector<1x128xf32>
    %444 = arith.mulf %435, %435 : vector<1x128xf32>
    %445 = arith.mulf %443, %443 : vector<1x128xf32>
    %446 = arith.addf %444, %445 : vector<1x128xf32>
    %447 = math.rsqrt %446 : vector<1x128xf32>
    %cst_140 = arith.constant 9.990000e-01 : f32
    %448 = vector.broadcast %cst_140 : f32 to vector<1x128xf32>
    %449 = arith.mulf %448, %447 : vector<1x128xf32>
    %cst_141 = arith.constant 1.000000e+00 : f32
    %450 = vector.broadcast %cst_141 : f32 to vector<1x128xf32>
    %451 = arith.minimumf %450, %449 : vector<1x128xf32>
    %452 = arith.mulf %435, %451 : vector<1x128xf32>
    %c0_142 = arith.constant 0 : index
    %c0_143 = arith.constant 0 : index
    %453 = vector.load %arg3[%c0_142, %c0_143] : memref<2x128xf32, #tpu.memory_space<vmem>>, vector<1x128xf32>
    tpu.vector_store %arg3[%c0_142, %c0_143], %452 {strides = array<i32>} : memref<2x128xf32, #tpu.memory_space<vmem>>, vector<1x128xf32>,
    %454 = arith.mulf %443, %451 : vector<1x128xf32>
    %c1_144 = arith.constant 1 : index
    %c0_145 = arith.constant 0 : index
    %455 = vector.load %arg3[%c1_144, %c0_145] : memref<2x128xf32, #tpu.memory_space<vmem>>, vector<1x128xf32>
    tpu.vector_store %arg3[%c1_144, %c0_145], %454 {strides = array<i32>} : memref<2x128xf32, #tpu.memory_space<vmem>>, vector<1x128xf32>,
    %c0_146 = arith.constant 0 : index
    %c0_147 = arith.constant 0 : index
    %456 = vector.load %arg3[%c0_146, %c0_147] : memref<2x128xf32, #tpu.memory_space<vmem>>, vector<2x128xf32>
    %457 = vector.extract_strided_slice %456 {offsets = [0, 0], sizes = [1, 128], strides = [1, 1]} : vector<2x128xf32> to vector<1x128xf32>
    %458 = vector.extract_strided_slice %456 {offsets = [1, 0], sizes = [1, 128], strides = [1, 1]} : vector<2x128xf32> to vector<1x128xf32>
    %459 = arith.mulf %457, %457 : vector<1x128xf32>
    %460 = arith.mulf %458, %458 : vector<1x128xf32>
    %461 = arith.addf %459, %460 : vector<1x128xf32>
    %462 = math.rsqrt %461 : vector<1x128xf32>
    %cst_148 = arith.constant 9.990000e-01 : f32
    %463 = vector.broadcast %cst_148 : f32 to vector<1x128xf32>
    %464 = arith.mulf %463, %462 : vector<1x128xf32>
    %cst_149 = arith.constant 1.000000e+00 : f32
    %465 = vector.broadcast %cst_149 : f32 to vector<1x128xf32>
    %466 = arith.minimumf %465, %464 : vector<1x128xf32>
    %467 = arith.mulf %457, %466 : vector<1x128xf32>
    %c0_150 = arith.constant 0 : index
    %c0_151 = arith.constant 0 : index
    %468 = vector.load %arg3[%c0_150, %c0_151] : memref<2x128xf32, #tpu.memory_space<vmem>>, vector<1x128xf32>
    tpu.vector_store %arg3[%c0_150, %c0_151], %467 {strides = array<i32>} : memref<2x128xf32, #tpu.memory_space<vmem>>, vector<1x128xf32>,
    %469 = arith.mulf %458, %466 : vector<1x128xf32>
    %c1_152 = arith.constant 1 : index
    %c0_153 = arith.constant 0 : index
    %470 = vector.load %arg3[%c1_152, %c0_153] : memref<2x128xf32, #tpu.memory_space<vmem>>, vector<1x128xf32>
    tpu.vector_store %arg3[%c1_152, %c0_153], %469 {strides = array<i32>} : memref<2x128xf32, #tpu.memory_space<vmem>>, vector<1x128xf32>,
    return
  }
}

</mosaic_0001>

<bundles_post_ra>
// kernel: tpu_custom_call.1
= control target key start
LH: loop header
LB: loop body
LE: loop exit
PB: predicated region body
PF: predicated region fallthrough
CT: control target
= control target key end

     0   :  { %9 = vsyncpa [#allocation4], 0  ;;  %s1698_s0 = inlined_call_operand.vmem [shape: f32[2,128], index: 0, kind: input, shape index: {}]   ;;  %s1699_s1 = inlined_call_operand.hbm [shape: bf16[128,128], index: 1, kind: input, shape index: {}]   ;;  %s1700_s2 = inlined_call_operand.<no memory space> [shape: f32[1], index: 2, kind: input, shape index: {}]   ;;  %s1701_s3 = inlined_call_operand.hbm [shape: f32[2,128], index: 3, kind: output, shape index: {}]  }
   0x1   :  { %10 = vsyncpa [#allocation5], 0  ;;  %s1434_s12 = smov [#allocation3]   ;;  %s1386_s16 = scalar_lea.hbm %s1699_s1, 1024 }
   0x2   :  { %s18_s13 = sshll.u32 %s1434_s12, 4  ;;  %p1387_p0 = scmp.ne.s32.totalorder %s1699_s1, %s1386_s16  ;;  %s19_s13 = int_to_ptr.vmem [resolvable:$true] %s18_s13 }
   0x3   :  { %p1390_p1 = scmp.lt.u32.totalorder %s1386_s16, %s1699_s1 }
   0x5   :  { %p1392_p2 = pnand %p1390_p1, %p1387_p0 }
   0x7   :  { %1395 = shalt.err (!%p1392_p2)
}
   0x8   :  { %s1396_s21 = scalar_lea.vmem %s19_s13, 1024  ;;  %p1401_p4 = scmp.lt.s32.totalorder %s19_s13, %s19_s13 }
   0x9   :  { %p1397_p3 = scmp.ne.s32.totalorder %s19_s13, %s1396_s21  ;;  %p1402_p5 = scmp.lt.s32.totalorder %s1396_s21, %s1396_s21 }
   0xb   :  { %p1403_p6 = por %p1402_p5, %p1401_p4 }
   0xd   :  { %p1404_p7 = pnand %p1403_p6, %p1397_p3 }
   0xf   :  { %1407 = shalt.err (!%p1404_p7)
}
  0x10   :  { %s1435_s22 = smov 64   ;;  %s1436_s23 = smov 4  }
  0x11   :  { %24 = dma.hbm_to_vmem [thread:$0]  %s1699_s1, 1024, %s19_s13, [#allocation4], %s1435_s22, %s1435_s22, %s1436_s23  }
  0x12   :  { %1430 = dma.done.wait [#allocation4], 1024  }
  0x13   :  { %1431 = vsyncadd [#allocation4], 4294966272  ;;  %v1437_v0 = vmov 0.0   ;;  %vm1438_vm0 = vmmov 0   ;;  %v1478_v1 = vld [vmem:[#allocation3] sm:$0xff]   ;;  %v1481_v2 = vld [vmem:[#allocation3 + $0x8] sm:$0xff]  }
  0x14   :  { %1150 = vmatprep.subr.bf16.mxu0 %v1437_v0  ;;  %1166 = vmatprep.mubr.msk.bf16.mxu0 %vm1438_vm0, %v1437_v0  ;;  %v1487_v3 = vld [vmem:[#allocation3 + $0x10] sm:$0xff]   ;;  %v31_v4 = vld [vmem:[%s1698_s0] sm:$0x3]  ;;  %v1496_v5 = vld [vmem:[#allocation3 + $0x18] sm:$0xff]   ;;  %s50_s28 = smul.f32 0.05, %s1700_s2 }
  0x15   :  { %1170 = vmatprep.subr.bf16.mxu1 %v1437_v0  ;;  %1186 = vmatprep.mubr.msk.bf16.mxu1 %vm1438_vm0, %v1437_v0  ;;  %32 = vst [vmem:[#allocation6] sm:$0x3] %v31_v4  ;;  %v1502_v6 = vld [vmem:[#allocation3 + $0x20] sm:$0xff]   ;;  %v1508_v7 = vld [vmem:[#allocation3 + $0x28] sm:$0xff]   ;;  %v1514_v8 = vld [vmem:[#allocation3 + $0x30] sm:$0xff]   ;;  %s1439_s2 = smov [#allocation6]  }
  0x16   :  { %1151 = vmatpush3.bf16.msra.mxu0 %v1478_v1  ;;  %1171 = vmatpush3.bf16.msra.mxu1 %v1478_v1  ;;  %v1520_v9 = vld [vmem:[#allocation3 + $0x38] sm:$0xff]   ;;  %s51_s29 = sadd.f32 1.0, %s50_s28  ;;  %s1043_s30 = sshll.u32 %s1439_s2, 4  ;;  %s1044_s30 = int_to_ptr.vmem [resolvable:$true] %s1043_s30 }
  0x17   :  { %1152 = vmatprep.subr.bf16.mxu0 %v1437_v0  ;;  %1172 = vmatprep.subr.bf16.mxu1 %v1437_v0  ;;  %s1408_s4 = scalar_lea.vmem %s1044_s30, 32  ;;  %p1413_p9 = scmp.lt.s32.totalorder %s1044_s30, %s1044_s30 }
  0x18   :  { %v1550_v19 = vstv %s51_s29  ;;  %p1409_p8 = scmp.ne.s32.totalorder %s1044_s30, %s1408_s4  ;;  %p1414_p10 = scmp.lt.s32.totalorder %s1408_s4, %s1408_s4 }
  0x1a   :  { %1153 = vmatpush3.bf16.msra.mxu0 %v1481_v2  ;;  %1173 = vmatpush3.bf16.msra.mxu1 %v1481_v2  ;;  %p1415_p11 = por %p1414_p10, %p1413_p9 }
  0x1b   :  { %1154 = vmatprep.subr.bf16.mxu0 %v1437_v0  ;;  %1174 = vmatprep.subr.bf16.mxu1 %v1437_v0 }
  0x1c   :  { %v52_v10 = vld [vmem:[#allocation6] sm:$0x3]  ;;  %p1416_p12 = pnand %p1415_p11, %p1409_p8 }
  0x1d   :  { %v53_v11 = vpack.c.bf16 %v52_v10, %v52_v10  ;;  %v143_v12 = vmul.f32 %v52_v10, %v52_v10  ;;  %v148_v15 = vmul.f32 2.0, %v52_v10  ;;  %v150_v16 = vrot.slane %v52_v10, 1 }
  0x1e   :  { %1155 = vmatpush3.bf16.msra.mxu0 %v1487_v3  ;;  %1175 = vmatpush3.bf16.msra.mxu1 %v1487_v3  ;;  %v154_v25 = vmul.f32 %v1550_v19, %v52_v10 }
  0x1f   :  { %1156 = vmatprep.subr.bf16.mxu0 %v1437_v0  ;;  %1176 = vmatprep.subr.bf16.mxu1 %v1437_v0  ;;  %v145_v13 = vrot.slane %v143_v12, 1  ;;  %v152_v17 = vmul.f32 %v150_v16, %v148_v15 }
  0x21   :  { %v147_v14 = vsub.f32 %v143_v12, %v145_v13  ;;  %v159_v21 = vrot.slane %v152_v17, 7 }
  0x22   :  { %1157 = vmatpush3.bf16.msra.mxu0 %v1496_v5  ;;  %1177 = vmatpush3.bf16.msra.mxu1 %v1496_v5 }
  0x23   :  { %1158 = vmatprep.subr.bf16.mxu0 %v1437_v0  ;;  %1178 = vmatprep.subr.bf16.mxu1 %v1437_v0  ;;  %v166_v18 = vadd.f32 1.0, %v147_v14  ;;  %v155_v20 = vsub.f32 1.0, %v147_v14 }
  0x25   :  { %v168_v22 = vrot.slane %v166_v18, 7 }
  0x26   :  { %1159 = vmatpush3.bf16.msra.mxu0 %v1502_v6  ;;  %1179 = vmatpush3.bf16.msra.mxu1 %v1502_v6 }
  0x27   :  { %1160 = vmatprep.subr.bf16.mxu0 %v1437_v0  ;;  %1180 = vmatprep.subr.bf16.mxu1 %v1437_v0 }
  0x2a   :  { %1161 = vmatpush3.bf16.msra.mxu0 %v1508_v7  ;;  %1181 = vmatpush3.bf16.msra.mxu1 %v1508_v7 }
  0x2b   :  { %1162 = vmatprep.subr.bf16.mxu0 %v1437_v0  ;;  %1182 = vmatprep.subr.bf16.mxu1 %v1437_v0 }
  0x2e   :  { %1163 = vmatpush3.bf16.msra.mxu0 %v1514_v8  ;;  %1183 = vmatpush3.bf16.msra.mxu1 %v1514_v8 }
  0x2f   :  { %1164 = vmatprep.subr.bf16.mxu0 %v1437_v0  ;;  %1184 = vmatprep.subr.bf16.mxu1 %v1437_v0 }
  0x32   :  { %1165 = vmatpush3.bf16.msra.mxu0 %v1520_v9  ;;  %1185 = vmatpush3.bf16.msra.mxu1 %v1520_v9 }
  0x33   :  { %1190 = vmatprep.subr.bf16.mxu0 %v1437_v0  ;;  %1210 = vmatprep.subr.bf16.mxu1 %v1437_v0 }
  0x35   :  { %1167 = vmatmul.mubr.bf16.vlgmr.msra.gmra.mrb[0].mxu0 %v53_v11 }
  0x36   :  { %1191 = vmatpush3.bf16.msra.mxu0 %v1478_v1  ;;  %1206 = vmatprep.mubr.msk.bf16.mxu0 %vm1438_vm0, %v1437_v0 }
  0x37   :  { %1192 = vmatprep.subr.bf16.mxu0 %v1437_v0 }
  0x3a   :  { %1193 = vmatpush3.bf16.msra.mxu0 %v1481_v2 }
  0x3b   :  { %1194 = vmatprep.subr.bf16.mxu0 %v1437_v0 }
  0x3e   :  { %1195 = vmatpush3.bf16.msra.mxu0 %v1487_v3 }
  0x3f   :  { %1196 = vmatprep.subr.bf16.mxu0 %v1437_v0 }
  0x42   :  { %1197 = vmatpush3.bf16.msra.mxu0 %v1496_v5 }
  0x43   :  { %1198 = vmatprep.subr.bf16.mxu0 %v1437_v0 }
  0x46   :  { %1199 = vmatpush3.bf16.msra.mxu0 %v1502_v6 }
  0x47   :  { %1200 = vmatprep.subr.bf16.mxu0 %v1437_v0 }
  0x4a   :  { %1201 = vmatpush3.bf16.msra.mxu0 %v1508_v7 }
  0x4b   :  { %1202 = vmatprep.subr.bf16.mxu0 %v1437_v0 }
  0x4e   :  { %1203 = vmatpush3.bf16.msra.mxu0 %v1514_v8 }
  0x4f   :  { %1204 = vmatprep.subr.bf16.mxu0 %v1437_v0 }
  0x52   :  { %1205 = vmatpush3.bf16.msra.mxu0 %v1520_v9 }
  0x53   :  { %1230 = vmatprep.subr.bf16.mxu0 %v1437_v0 }
 0x108   :  { %v136_v23 = vpop.f32.mrb[0].mxu0 }
 0x109   :  { %v142_v24 = vmul.f32 0.000390625, %v136_v23  ;;  %v1168_v26 = vpop.f32.mrb[1].mxu0 }
 0x10a   :  { %v139_v27 = vpop.f32.mrb[2].mxu0 }
 0x10b   :  { %v156_v28 = vmul.f32 %v155_v20, %v142_v24  ;;  %v161_v29 = vmul.f32 %v159_v21, %v142_v24  ;;  %v170_v30 = vmul.f32 %v168_v22, %v142_v24  ;;  %v172_v31 = vmul.f32 %v152_v17, %v142_v24  ;;  %v1169_v32 = vpop.f32.mrb[3].mxu0 }
 0x10d   :  { %v157_v33 = vadd.f32 %v156_v28, %v154_v25  ;;  %v163_v34 = vrot.slane %v161_v29, 1  ;;  %v171_v35 = vadd.f32 %v170_v30, %v154_v25  ;;  %v174_v36 = vrot.slane %v172_v31, 7 }
 0x10f   :  { %v165_v37 = vsub.f32 %v157_v33, %v163_v34  ;;  %v176_v38 = vsub.f32 %v171_v35, %v174_v36 }
 0x111   :  { %v178_v39 = vmul.f32 %v176_v38, %v176_v38  ;;  %v177_v40 = vmul.f32 %v165_v37, %v165_v37 }
 0x113   :  { %v180_v41 = vrot.slane %v178_v39, 1 }
 0x115   :  { %v182_v42 = vadd.f32 %v180_v41, %v177_v40 }
 0x117   :  { %1364 = vrsqrt.f32 %v182_v42 }
 0x121   :  { %v1365_v43 = vpop.eup %1364 }
 0x122   :  { %v184_v44 = vmul.f32 0.999, %v1365_v43 }
 0x124   :  { %v185_v45 = vmin.f32 %v184_v44, 1.0 }
 0x126   :  { %v186_v46 = vmul.f32 %v185_v45, %v165_v37  ;;  %v189_v47 = vrot.slane %v185_v45, 7 }
 0x128   :  { %187 = vst [vmem:[#allocation6] sm:$0x1] %v186_v46  ;;  %v191_v48 = vmul.f32 %v189_v47, %v176_v38 }
 0x12a   :  { %192 = vst [vmem:[#allocation6] sm:$0x2] %v191_v48 }
 0x131   :  { %v193_v49 = vld [vmem:[#allocation6] sm:$0x3] }
 0x132   :  { %v194_v50 = vpack.c.bf16 %v193_v49, %v193_v49  ;;  %v236_v51 = vmul.f32 %v193_v49, %v193_v49  ;;  %v241_v54 = vmul.f32 2.0, %v193_v49  ;;  %v243_v55 = vrot.slane %v193_v49, 1 }
 0x133   :  { %v246_v4 = vmul.f32 %v193_v49, %v1550_v19 }
 0x134   :  { %1187 = vmatmul.mubr.bf16.vlgmr.msra.gmra.mrb[0].mxu1 %v194_v50  ;;  %v238_v52 = vrot.slane %v236_v51, 1  ;;  %v245_v56 = vmul.f32 %v243_v55, %v241_v54 }
 0x135   :  { %1211 = vmatpush3.bf16.msra.mxu1 %v1478_v1  ;;  %1226 = vmatprep.mubr.msk.bf16.mxu1 %vm1438_vm0, %v1437_v0 }
 0x136   :  { %1212 = vmatprep.subr.bf16.mxu1 %v1437_v0  ;;  %v240_v53 = vsub.f32 %v236_v51, %v238_v52  ;;  %v251_v61 = vrot.slane %v245_v56, 7 }
 0x138   :  { %v258_v57 = vadd.f32 1.0, %v240_v53  ;;  %v247_v60 = vsub.f32 1.0, %v240_v53 }
 0x139   :  { %1213 = vmatpush3.bf16.msra.mxu1 %v1481_v2 }
 0x13a   :  { %1214 = vmatprep.subr.bf16.mxu1 %v1437_v0  ;;  %v260_v62 = vrot.slane %v258_v57, 7 }
 0x13d   :  { %1215 = vmatpush3.bf16.msra.mxu1 %v1487_v3 }
 0x13e   :  { %1216 = vmatprep.subr.bf16.mxu1 %v1437_v0 }
 0x141   :  { %1217 = vmatpush3.bf16.msra.mxu1 %v1496_v5 }
 0x142   :  { %1218 = vmatprep.subr.bf16.mxu1 %v1437_v0 }
 0x145   :  { %1219 = vmatpush3.bf16.msra.mxu1 %v1502_v6 }
 0x146   :  { %1220 = vmatprep.subr.bf16.mxu1 %v1437_v0 }
 0x149   :  { %1221 = vmatpush3.bf16.msra.mxu1 %v1508_v7 }
 0x14a   :  { %1222 = vmatprep.subr.bf16.mxu1 %v1437_v0 }
 0x14d   :  { %1223 = vmatpush3.bf16.msra.mxu1 %v1514_v8 }
 0x14e   :  { %1224 = vmatprep.subr.bf16.mxu1 %v1437_v0 }
 0x151   :  { %1225 = vmatpush3.bf16.msra.mxu1 %v1520_v9 }
 0x152   :  { %1250 = vmatprep.subr.bf16.mxu1 %v1437_v0 }
 0x207   :  { %v229_v58 = vpop.f32.mrb[0].mxu1 }
 0x208   :  { %v235_v59 = vmul.f32 0.000390625, %v229_v58  ;;  %v1188_v63 = vpop.f32.mrb[1].mxu1 }
 0x209   :  { %v232_v10 = vpop.f32.mrb[2].mxu1 }
 0x20a   :  { %v248_v11 = vmul.f32 %v247_v60, %v235_v59  ;;  %v253_v12 = vmul.f32 %v251_v61, %v235_v59  ;;  %v262_v13 = vmul.f32 %v260_v62, %v235_v59  ;;  %v264_v14 = vmul.f32 %v245_v56, %v235_v59  ;;  %v1189_v15 = vpop.f32.mrb[3].mxu1 }
 0x20c   :  { %v249_v16 = vadd.f32 %v248_v11, %v246_v4  ;;  %v255_v17 = vrot.slane %v253_v12, 1  ;;  %v263_v18 = vadd.f32 %v262_v13, %v246_v4  ;;  %v266_v20 = vrot.slane %v264_v14, 7 }
 0x20e   :  { %v257_v21 = vsub.f32 %v249_v16, %v255_v17  ;;  %v268_v22 = vsub.f32 %v263_v18, %v266_v20 }
 0x210   :  { %v270_v23 = vmul.f32 %v268_v22, %v268_v22  ;;  %v269_v24 = vmul.f32 %v257_v21, %v257_v21 }
 0x212   :  { %v272_v25 = vrot.slane %v270_v23, 1 }
 0x214   :  { %v274_v26 = vadd.f32 %v272_v25, %v269_v24 }
 0x216   :  { %1366 = vrsqrt.f32 %v274_v26 }
 0x220   :  { %v1367_v27 = vpop.eup %1366 }
 0x221   :  { %v276_v28 = vmul.f32 0.999, %v1367_v27 }
 0x223   :  { %v277_v29 = vmin.f32 %v276_v28, 1.0 }
 0x225   :  { %v278_v30 = vmul.f32 %v277_v29, %v257_v21  ;;  %v281_v31 = vrot.slane %v277_v29, 7 }
 0x227   :  { %279 = vst [vmem:[#allocation6] sm:$0x1] %v278_v30  ;;  %v283_v32 = vmul.f32 %v281_v31, %v268_v22 }
 0x229   :  { %284 = vst [vmem:[#allocation6] sm:$0x2] %v283_v32 }
 0x230   :  { %v285_v33 = vld [vmem:[#allocation6] sm:$0x3] }
 0x231   :  { %v286_v34 = vpack.c.bf16 %v285_v33, %v285_v33  ;;  %v328_v35 = vmul.f32 %v285_v33, %v285_v33  ;;  %v333_v38 = vmul.f32 2.0, %v285_v33  ;;  %v335_v39 = vrot.slane %v285_v33, 1 }
 0x232   :  { %v338_v48 = vmul.f32 %v285_v33, %v1550_v19 }
 0x233   :  { %1207 = vmatmul.mubr.bf16.vlgmr.msra.gmra.mrb[4].mxu0 %v286_v34  ;;  %v330_v36 = vrot.slane %v328_v35, 1  ;;  %v337_v40 = vmul.f32 %v335_v39, %v333_v38 }
 0x234   :  { %1231 = vmatpush3.bf16.msra.mxu0 %v1478_v1  ;;  %1246 = vmatprep.mubr.msk.bf16.mxu0 %vm1438_vm0, %v1437_v0 }
 0x235   :  { %1232 = vmatprep.subr.bf16.mxu0 %v1437_v0  ;;  %v332_v37 = vsub.f32 %v328_v35, %v330_v36  ;;  %v343_v45 = vrot.slane %v337_v40, 7 }
 0x237   :  { %v350_v41 = vadd.f32 1.0, %v332_v37  ;;  %v339_v44 = vsub.f32 1.0, %v332_v37 }
 0x238   :  { %1233 = vmatpush3.bf16.msra.mxu0 %v1481_v2 }
 0x239   :  { %1234 = vmatprep.subr.bf16.mxu0 %v1437_v0  ;;  %v352_v46 = vrot.slane %v350_v41, 7 }
 0x23c   :  { %1235 = vmatpush3.bf16.msra.mxu0 %v1487_v3 }
 0x23d   :  { %1236 = vmatprep.subr.bf16.mxu0 %v1437_v0 }
 0x240   :  { %1237 = vmatpush3.bf16.msra.mxu0 %v1496_v5 }
 0x241   :  { %1238 = vmatprep.subr.bf16.mxu0 %v1437_v0 }
 0x244   :  { %1239 = vmatpush3.bf16.msra.mxu0 %v1502_v6 }
 0x245   :  { %1240 = vmatprep.subr.bf16.mxu0 %v1437_v0 }
 0x248   :  { %1241 = vmatpush3.bf16.msra.mxu0 %v1508_v7 }
 0x249   :  { %1242 = vmatprep.subr.bf16.mxu0 %v1437_v0 }
 0x24c   :  { %1243 = vmatpush3.bf16.msra.mxu0 %v1514_v8 }
 0x24d   :  { %1244 = vmatprep.subr.bf16.mxu0 %v1437_v0 }
 0x250   :  { %1245 = vmatpush3.bf16.msra.mxu0 %v1520_v9 }
 0x251   :  { %1270 = vmatprep.subr.bf16.mxu0 %v1437_v0 }
 0x306   :  { %v321_v42 = vpop.f32.mrb[4].mxu0 }
 0x307   :  { %v327_v43 = vmul.f32 0.000390625, %v321_v42  ;;  %v1208_v47 = vpop.f32.mrb[5].mxu0 }
 0x308   :  { %v324_v49 = vpop.f32.mrb[6].mxu0 }
 0x309   :  { %v340_v50 = vmul.f32 %v339_v44, %v327_v43  ;;  %v345_v51 = vmul.f32 %v343_v45, %v327_v43  ;;  %v354_v52 = vmul.f32 %v352_v46, %v327_v43  ;;  %v356_v53 = vmul.f32 %v337_v40, %v327_v43  ;;  %v1209_v54 = vpop.f32.mrb[7].mxu0 }
 0x30b   :  { %v341_v55 = vadd.f32 %v340_v50, %v338_v48  ;;  %v347_v56 = vrot.slane %v345_v51, 1  ;;  %v355_v57 = vadd.f32 %v354_v52, %v338_v48  ;;  %v358_v58 = vrot.slane %v356_v53, 7 }
 0x30d   :  { %v349_v59 = vsub.f32 %v341_v55, %v347_v56  ;;  %v360_v60 = vsub.f32 %v355_v57, %v358_v58 }
 0x30f   :  { %v362_v61 = vmul.f32 %v360_v60, %v360_v60  ;;  %v361_v62 = vmul.f32 %v349_v59, %v349_v59 }
 0x311   :  { %v364_v63 = vrot.slane %v362_v61, 1 }
 0x313   :  { %v366_v4 = vadd.f32 %v364_v63, %v361_v62 }
 0x315   :  { %1368 = vrsqrt.f32 %v366_v4 }
 0x31f   :  { %v1369_v10 = vpop.eup %1368 }
 0x320   :  { %v368_v11 = vmul.f32 0.999, %v1369_v10 }
 0x322   :  { %v369_v12 = vmin.f32 %v368_v11, 1.0 }
 0x324   :  { %v370_v13 = vmul.f32 %v369_v12, %v349_v59  ;;  %v373_v14 = vrot.slane %v369_v12, 7 }
 0x326   :  { %371 = vst [vmem:[#allocation6] sm:$0x1] %v370_v13  ;;  %v375_v15 = vmul.f32 %v373_v14, %v360_v60 }
 0x328   :  { %376 = vst [vmem:[#allocation6] sm:$0x2] %v375_v15 }
 0x32f   :  { %v377_v16 = vld [vmem:[#allocation6] sm:$0x3] }
 0x330   :  { %v378_v17 = vpack.c.bf16 %v377_v16, %v377_v16  ;;  %v420_v18 = vmul.f32 %v377_v16, %v377_v16  ;;  %v425_v22 = vmul.f32 2.0, %v377_v16  ;;  %v427_v23 = vrot.slane %v377_v16, 1 }
 0x331   :  { %v430_v32 = vmul.f32 %v377_v16, %v1550_v19 }
 0x332   :  { %1227 = vmatmul.mubr.bf16.vlgmr.msra.gmra.mrb[4].mxu1 %v378_v17  ;;  %v422_v20 = vrot.slane %v420_v18, 1  ;;  %v429_v24 = vmul.f32 %v427_v23, %v425_v22 }
 0x333   :  { %1251 = vmatpush3.bf16.msra.mxu1 %v1478_v1  ;;  %1266 = vmatprep.mubr.msk.bf16.mxu1 %vm1438_vm0, %v1437_v0 }
 0x334   :  { %1252 = vmatprep.subr.bf16.mxu1 %v1437_v0  ;;  %v424_v21 = vsub.f32 %v420_v18, %v422_v20  ;;  %v435_v29 = vrot.slane %v429_v24, 7 }
 0x336   :  { %v442_v25 = vadd.f32 1.0, %v424_v21  ;;  %v431_v28 = vsub.f32 1.0, %v424_v21 }
 0x337   :  { %1253 = vmatpush3.bf16.msra.mxu1 %v1481_v2 }
 0x338   :  { %1254 = vmatprep.subr.bf16.mxu1 %v1437_v0  ;;  %v444_v30 = vrot.slane %v442_v25, 7 }
 0x33b   :  { %1255 = vmatpush3.bf16.msra.mxu1 %v1487_v3 }
 0x33c   :  { %1256 = vmatprep.subr.bf16.mxu1 %v1437_v0 }
 0x33f   :  { %1257 = vmatpush3.bf16.msra.mxu1 %v1496_v5 }
 0x340   :  { %1258 = vmatprep.subr.bf16.mxu1 %v1437_v0 }
 0x343   :  { %1259 = vmatpush3.bf16.msra.mxu1 %v1502_v6 }
 0x344   :  { %1260 = vmatprep.subr.bf16.mxu1 %v1437_v0 }
 0x347   :  { %1261 = vmatpush3.bf16.msra.mxu1 %v1508_v7 }
 0x348   :  { %1262 = vmatprep.subr.bf16.mxu1 %v1437_v0 }
 0x34b   :  { %1263 = vmatpush3.bf16.msra.mxu1 %v1514_v8 }
 0x34c   :  { %1264 = vmatprep.subr.bf16.mxu1 %v1437_v0 }
 0x34f   :  { %1265 = vmatpush3.bf16.msra.mxu1 %v1520_v9 }
 0x350   :  { %1290 = vmatprep.subr.bf16.mxu1 %v1437_v0 }
 0x405   :  { %v413_v26 = vpop.f32.mrb[4].mxu1 }
 0x406   :  { %v419_v27 = vmul.f32 0.000390625, %v413_v26  ;;  %v1228_v31 = vpop.f32.mrb[5].mxu1 }
 0x407   :  { %v416_v33 = vpop.f32.mrb[6].mxu1 }
 0x408   :  { %v432_v34 = vmul.f32 %v431_v28, %v419_v27  ;;  %v437_v35 = vmul.f32 %v435_v29, %v419_v27  ;;  %v446_v36 = vmul.f32 %v444_v30, %v419_v27  ;;  %v448_v37 = vmul.f32 %v429_v24, %v419_v27  ;;  %v1229_v38 = vpop.f32.mrb[7].mxu1 }
 0x40a   :  { %v433_v39 = vadd.f32 %v432_v34, %v430_v32  ;;  %v439_v40 = vrot.slane %v437_v35, 1  ;;  %v447_v41 = vadd.f32 %v446_v36, %v430_v32  ;;  %v450_v42 = vrot.slane %v448_v37, 7 }
 0x40c   :  { %v441_v43 = vsub.f32 %v433_v39, %v439_v40  ;;  %v452_v44 = vsub.f32 %v447_v41, %v450_v42 }
 0x40e   :  { %v454_v45 = vmul.f32 %v452_v44, %v452_v44  ;;  %v453_v46 = vmul.f32 %v441_v43, %v441_v43 }
 0x410   :  { %v456_v47 = vrot.slane %v454_v45, 1 }
 0x412   :  { %v458_v48 = vadd.f32 %v456_v47, %v453_v46 }
 0x414   :  { %1370 = vrsqrt.f32 %v458_v48 }
 0x41e   :  { %v1371_v49 = vpop.eup %1370 }
 0x41f   :  { %v460_v50 = vmul.f32 0.999, %v1371_v49 }
 0x421   :  { %v461_v51 = vmin.f32 %v460_v50, 1.0 }
 0x423   :  { %v462_v52 = vmul.f32 %v461_v51, %v441_v43  ;;  %v465_v53 = vrot.slane %v461_v51, 7 }
 0x425   :  { %463 = vst [vmem:[#allocation6] sm:$0x1] %v462_v52  ;;  %v467_v54 = vmul.f32 %v465_v53, %v452_v44 }
 0x427   :  { %468 = vst [vmem:[#allocation6] sm:$0x2] %v467_v54 }
 0x42e   :  { %v469_v55 = vld [vmem:[#allocation6] sm:$0x3] }
 0x42f   :  { %v470_v56 = vpack.c.bf16 %v469_v55, %v469_v55  ;;  %v512_v57 = vmul.f32 %v469_v55, %v469_v55  ;;  %v517_v60 = vmul.f32 2.0, %v469_v55  ;;  %v519_v61 = vrot.slane %v469_v55, 1 }
 0x430   :  { %v522_v15 = vmul.f32 %v469_v55, %v1550_v19 }
 0x431   :  { %1247 = vmatmul.mubr.bf16.vlgmr.msra.gmra.mrb[8].mxu0 %v470_v56  ;;  %v514_v58 = vrot.slane %v512_v57, 1  ;;  %v521_v62 = vmul.f32 %v519_v61, %v517_v60 }
 0x432   :  { %1271 = vmatpush3.bf16.msra.mxu0 %v1478_v1  ;;  %1286 = vmatprep.mubr.msk.bf16.mxu0 %vm1438_vm0, %v1437_v0 }
 0x433   :  { %1272 = vmatprep.subr.bf16.mxu0 %v1437_v0  ;;  %v516_v59 = vsub.f32 %v512_v57, %v514_v58  ;;  %v527_v12 = vrot.slane %v521_v62, 7 }
 0x435   :  { %v534_v63 = vadd.f32 1.0, %v516_v59  ;;  %v523_v11 = vsub.f32 1.0, %v516_v59 }
 0x436   :  { %1273 = vmatpush3.bf16.msra.mxu0 %v1481_v2 }
 0x437   :  { %1274 = vmatprep.subr.bf16.mxu0 %v1437_v0  ;;  %v536_v13 = vrot.slane %v534_v63, 7 }
 0x43a   :  { %1275 = vmatpush3.bf16.msra.mxu0 %v1487_v3 }
 0x43b   :  { %1276 = vmatprep.subr.bf16.mxu0 %v1437_v0 }
 0x43e   :  { %1277 = vmatpush3.bf16.msra.mxu0 %v1496_v5 }
 0x43f   :  { %1278 = vmatprep.subr.bf16.mxu0 %v1437_v0 }
 0x442   :  { %1279 = vmatpush3.bf16.msra.mxu0 %v1502_v6 }
 0x443   :  { %1280 = vmatprep.subr.bf16.mxu0 %v1437_v0 }
 0x446   :  { %1281 = vmatpush3.bf16.msra.mxu0 %v1508_v7 }
 0x447   :  { %1282 = vmatprep.subr.bf16.mxu0 %v1437_v0 }
 0x44a   :  { %1283 = vmatpush3.bf16.msra.mxu0 %v1514_v8 }
 0x44b   :  { %1284 = vmatprep.subr.bf16.mxu0 %v1437_v0 }
 0x44e   :  { %1285 = vmatpush3.bf16.msra.mxu0 %v1520_v9 }
 0x44f   :  { %1310 = vmatprep.subr.bf16.mxu0 %v1437_v0 }
 0x504   :  { %v505_v4 = vpop.f32.mrb[8].mxu0 }
 0x505   :  { %v511_v10 = vmul.f32 0.000390625, %v505_v4  ;;  %v1248_v14 = vpop.f32.mrb[9].mxu0 }
 0x506   :  { %v508_v16 = vpop.f32.mrb[10].mxu0 }
 0x507   :  { %v524_v17 = vmul.f32 %v523_v11, %v511_v10  ;;  %v529_v18 = vmul.f32 %v527_v12, %v511_v10  ;;  %v538_v20 = vmul.f32 %v536_v13, %v511_v10  ;;  %v540_v21 = vmul.f32 %v521_v62, %v511_v10  ;;  %v1249_v22 = vpop.f32.mrb[11].mxu0 }
 0x509   :  { %v525_v23 = vadd.f32 %v524_v17, %v522_v15  ;;  %v531_v24 = vrot.slane %v529_v18, 1  ;;  %v539_v25 = vadd.f32 %v538_v20, %v522_v15  ;;  %v542_v26 = vrot.slane %v540_v21, 7 }
 0x50b   :  { %v533_v27 = vsub.f32 %v525_v23, %v531_v24  ;;  %v544_v28 = vsub.f32 %v539_v25, %v542_v26 }
 0x50d   :  { %v546_v29 = vmul.f32 %v544_v28, %v544_v28  ;;  %v545_v30 = vmul.f32 %v533_v27, %v533_v27 }
 0x50f   :  { %v548_v31 = vrot.slane %v546_v29, 1 }
 0x511   :  { %v550_v32 = vadd.f32 %v548_v31, %v545_v30 }
 0x513   :  { %1372 = vrsqrt.f32 %v550_v32 }
 0x51d   :  { %v1373_v33 = vpop.eup %1372 }
 0x51e   :  { %v552_v34 = vmul.f32 0.999, %v1373_v33 }
 0x520   :  { %v553_v35 = vmin.f32 %v552_v34, 1.0 }
 0x522   :  { %v554_v36 = vmul.f32 %v553_v35, %v533_v27  ;;  %v557_v37 = vrot.slane %v553_v35, 7 }
 0x524   :  { %555 = vst [vmem:[#allocation6] sm:$0x1] %v554_v36  ;;  %v559_v38 = vmul.f32 %v557_v37, %v544_v28 }
 0x526   :  { %560 = vst [vmem:[#allocation6] sm:$0x2] %v559_v38 }
 0x52d   :  { %v561_v39 = vld [vmem:[#allocation6] sm:$0x3] }
 0x52e   :  { %v562_v40 = vpack.c.bf16 %v561_v39, %v561_v39  ;;  %v604_v41 = vmul.f32 %v561_v39, %v561_v39  ;;  %v609_v44 = vmul.f32 2.0, %v561_v39  ;;  %v611_v45 = vrot.slane %v561_v39, 1 }
 0x52f   :  { %v614_v54 = vmul.f32 %v561_v39, %v1550_v19 }
 0x530   :  { %1267 = vmatmul.mubr.bf16.vlgmr.msra.gmra.mrb[8].mxu1 %v562_v40  ;;  %v606_v42 = vrot.slane %v604_v41, 1  ;;  %v613_v46 = vmul.f32 %v611_v45, %v609_v44 }
 0x531   :  { %1291 = vmatpush3.bf16.msra.mxu1 %v1478_v1  ;;  %1306 = vmatprep.mubr.msk.bf16.mxu1 %vm1438_vm0, %v1437_v0 }
 0x532   :  { %1292 = vmatprep.subr.bf16.mxu1 %v1437_v0  ;;  %v608_v43 = vsub.f32 %v604_v41, %v606_v42  ;;  %v619_v51 = vrot.slane %v613_v46, 7 }
 0x534   :  { %v626_v47 = vadd.f32 1.0, %v608_v43  ;;  %v615_v50 = vsub.f32 1.0, %v608_v43 }
 0x535   :  { %1293 = vmatpush3.bf16.msra.mxu1 %v1481_v2 }
 0x536   :  { %1294 = vmatprep.subr.bf16.mxu1 %v1437_v0  ;;  %v628_v52 = vrot.slane %v626_v47, 7 }
 0x539   :  { %1295 = vmatpush3.bf16.msra.mxu1 %v1487_v3 }
 0x53a   :  { %1296 = vmatprep.subr.bf16.mxu1 %v1437_v0 }
 0x53d   :  { %1297 = vmatpush3.bf16.msra.mxu1 %v1496_v5 }
 0x53e   :  { %1298 = vmatprep.subr.bf16.mxu1 %v1437_v0 }
 0x541   :  { %1299 = vmatpush3.bf16.msra.mxu1 %v1502_v6 }
 0x542   :  { %1300 = vmatprep.subr.bf16.mxu1 %v1437_v0 }
 0x545   :  { %1301 = vmatpush3.bf16.msra.mxu1 %v1508_v7 }
 0x546   :  { %1302 = vmatprep.subr.bf16.mxu1 %v1437_v0 }
 0x549   :  { %1303 = vmatpush3.bf16.msra.mxu1 %v1514_v8 }
 0x54a   :  { %1304 = vmatprep.subr.bf16.mxu1 %v1437_v0 }
 0x54d   :  { %1305 = vmatpush3.bf16.msra.mxu1 %v1520_v9 }
 0x54e   :  { %1330 = vmatprep.subr.bf16.mxu1 %v1437_v0 }
 0x603   :  { %v597_v48 = vpop.f32.mrb[8].mxu1 }
 0x604   :  { %v603_v49 = vmul.f32 0.000390625, %v597_v48  ;;  %v1268_v53 = vpop.f32.mrb[9].mxu1 }
 0x605   :  { %v600_v55 = vpop.f32.mrb[10].mxu1 }
 0x606   :  { %v616_v56 = vmul.f32 %v615_v50, %v603_v49  ;;  %v621_v57 = vmul.f32 %v619_v51, %v603_v49  ;;  %v630_v58 = vmul.f32 %v628_v52, %v603_v49  ;;  %v632_v59 = vmul.f32 %v613_v46, %v603_v49  ;;  %v1269_v60 = vpop.f32.mrb[11].mxu1 }
 0x608   :  { %v617_v61 = vadd.f32 %v616_v56, %v614_v54  ;;  %v623_v62 = vrot.slane %v621_v57, 1  ;;  %v631_v63 = vadd.f32 %v630_v58, %v614_v54  ;;  %v634_v4 = vrot.slane %v632_v59, 7 }
 0x60a   :  { %v625_v10 = vsub.f32 %v617_v61, %v623_v62  ;;  %v636_v11 = vsub.f32 %v631_v63, %v634_v4 }
 0x60c   :  { %v638_v12 = vmul.f32 %v636_v11, %v636_v11  ;;  %v637_v13 = vmul.f32 %v625_v10, %v625_v10 }
 0x60e   :  { %v640_v14 = vrot.slane %v638_v12, 1 }
 0x610   :  { %v642_v15 = vadd.f32 %v640_v14, %v637_v13 }
 0x612   :  { %1374 = vrsqrt.f32 %v642_v15 }
 0x61c   :  { %v1375_v16 = vpop.eup %1374 }
 0x61d   :  { %v644_v17 = vmul.f32 0.999, %v1375_v16 }
 0x61f   :  { %v645_v18 = vmin.f32 %v644_v17, 1.0 }
 0x621   :  { %v646_v20 = vmul.f32 %v645_v18, %v625_v10  ;;  %v649_v21 = vrot.slane %v645_v18, 7 }
 0x623   :  { %647 = vst [vmem:[#allocation6] sm:$0x1] %v646_v20  ;;  %v651_v22 = vmul.f32 %v649_v21, %v636_v11 }
 0x625   :  { %652 = vst [vmem:[#allocation6] sm:$0x2] %v651_v22 }
 0x62c   :  { %v653_v23 = vld [vmem:[#allocation6] sm:$0x3] }
 0x62d   :  { %v654_v24 = vpack.c.bf16 %v653_v23, %v653_v23  ;;  %v696_v25 = vmul.f32 %v653_v23, %v653_v23  ;;  %v701_v28 = vmul.f32 2.0, %v653_v23  ;;  %v703_v29 = vrot.slane %v653_v23, 1 }
 0x62e   :  { %v706_v38 = vmul.f32 %v653_v23, %v1550_v19 }
 0x62f   :  { %1287 = vmatmul.mubr.bf16.vlgmr.msra.gmra.mrb[12].mxu0 %v654_v24  ;;  %v698_v26 = vrot.slane %v696_v25, 1  ;;  %v705_v30 = vmul.f32 %v703_v29, %v701_v28 }
 0x630   :  { %1311 = vmatpush3.bf16.msra.mxu0 %v1478_v1  ;;  %1326 = vmatprep.mubr.msk.bf16.mxu0 %vm1438_vm0, %v1437_v0 }
 0x631   :  { %1312 = vmatprep.subr.bf16.mxu0 %v1437_v0  ;;  %v700_v27 = vsub.f32 %v696_v25, %v698_v26  ;;  %v711_v35 = vrot.slane %v705_v30, 7 }
 0x633   :  { %v718_v31 = vadd.f32 1.0, %v700_v27  ;;  %v707_v34 = vsub.f32 1.0, %v700_v27 }
 0x634   :  { %1313 = vmatpush3.bf16.msra.mxu0 %v1481_v2 }
 0x635   :  { %1314 = vmatprep.subr.bf16.mxu0 %v1437_v0  ;;  %v720_v36 = vrot.slane %v718_v31, 7 }
 0x638   :  { %1315 = vmatpush3.bf16.msra.mxu0 %v1487_v3 }
 0x639   :  { %1316 = vmatprep.subr.bf16.mxu0 %v1437_v0 }
 0x63c   :  { %1317 = vmatpush3.bf16.msra.mxu0 %v1496_v5 }
 0x63d   :  { %1318 = vmatprep.subr.bf16.mxu0 %v1437_v0 }
 0x640   :  { %1319 = vmatpush3.bf16.msra.mxu0 %v1502_v6 }
 0x641   :  { %1320 = vmatprep.subr.bf16.mxu0 %v1437_v0 }
 0x644   :  { %1321 = vmatpush3.bf16.msra.mxu0 %v1508_v7 }
 0x645   :  { %1322 = vmatprep.subr.bf16.mxu0 %v1437_v0 }
 0x648   :  { %1323 = vmatpush3.bf16.msra.mxu0 %v1514_v8 }
 0x649   :  { %1324 = vmatprep.subr.bf16.mxu0 %v1437_v0 }
 0x64c   :  { %1325 = vmatpush3.bf16.msra.mxu0 %v1520_v9 }
 0x702   :  { %v689_v32 = vpop.f32.mrb[12].mxu0 }
 0x703   :  { %v695_v33 = vmul.f32 0.000390625, %v689_v32  ;;  %v1288_v37 = vpop.f32.mrb[13].mxu0 }
 0x704   :  { %v692_v39 = vpop.f32.mrb[14].mxu0 }
 0x705   :  { %v708_v40 = vmul.f32 %v707_v34, %v695_v33  ;;  %v713_v41 = vmul.f32 %v711_v35, %v695_v33  ;;  %v722_v42 = vmul.f32 %v720_v36, %v695_v33  ;;  %v724_v43 = vmul.f32 %v705_v30, %v695_v33  ;;  %v1289_v44 = vpop.f32.mrb[15].mxu0 }
 0x707   :  { %v709_v45 = vadd.f32 %v708_v40, %v706_v38  ;;  %v715_v46 = vrot.slane %v713_v41, 1  ;;  %v723_v47 = vadd.f32 %v722_v42, %v706_v38  ;;  %v726_v48 = vrot.slane %v724_v43, 7 }
 0x709   :  { %v717_v49 = vsub.f32 %v709_v45, %v715_v46  ;;  %v728_v50 = vsub.f32 %v723_v47, %v726_v48 }
 0x70b   :  { %v730_v51 = vmul.f32 %v728_v50, %v728_v50  ;;  %v729_v52 = vmul.f32 %v717_v49, %v717_v49 }
 0x70d   :  { %v732_v53 = vrot.slane %v730_v51, 1 }
 0x70f   :  { %v734_v54 = vadd.f32 %v732_v53, %v729_v52 }
 0x711   :  { %1376 = vrsqrt.f32 %v734_v54 }
 0x71b   :  { %v1377_v55 = vpop.eup %1376 }
 0x71c   :  { %v736_v56 = vmul.f32 0.999, %v1377_v55 }
 0x71e   :  { %v737_v57 = vmin.f32 %v736_v56, 1.0 }
 0x720   :  { %v738_v58 = vmul.f32 %v737_v57, %v717_v49  ;;  %v741_v59 = vrot.slane %v737_v57, 7 }
 0x722   :  { %739 = vst [vmem:[#allocation6] sm:$0x1] %v738_v58  ;;  %v743_v60 = vmul.f32 %v741_v59, %v728_v50 }
 0x724   :  { %744 = vst [vmem:[#allocation6] sm:$0x2] %v743_v60 }
 0x72b   :  { %v745_v61 = vld [vmem:[#allocation6] sm:$0x3] }
 0x72c   :  { %v746_v62 = vpack.c.bf16 %v745_v61, %v745_v61  ;;  %v795_v63 = vrot.slane %v745_v61, 1  ;;  %v798_v15 = vmul.f32 %v745_v61, %v1550_v19 }
 0x72e   :  { %1307 = vmatmul.mubr.bf16.vlgmr.msra.gmra.mrb[12].mxu1 %v746_v62 }
 0x72f   :  { %1331 = vmatpush3.bf16.msra.mxu1 %v1478_v1  ;;  %1346 = vmatprep.mubr.msk.bf16.mxu1 %vm1438_vm0, %v1437_v0  ;;  %v788_v1 = vmul.f32 %v745_v61, %v745_v61 }
 0x730   :  { %1332 = vmatprep.subr.bf16.mxu1 %v1437_v0 }
 0x733   :  { %1333 = vmatpush3.bf16.msra.mxu1 %v1481_v2  ;;  %v790_v2 = vrot.slane %v788_v1, 1 }
 0x734   :  { %1334 = vmatprep.subr.bf16.mxu1 %v1437_v0 }
 0x737   :  { %1335 = vmatpush3.bf16.msra.mxu1 %v1487_v3  ;;  %v792_v3 = vsub.f32 %v788_v1, %v790_v2 }
 0x738   :  { %1336 = vmatprep.subr.bf16.mxu1 %v1437_v0 }
 0x739   :  { %v810_v10 = vadd.f32 1.0, %v792_v3  ;;  %v799_v12 = vsub.f32 1.0, %v792_v3 }
 0x73b   :  { %1337 = vmatpush3.bf16.msra.mxu1 %v1496_v5  ;;  %v793_v5 = vmul.f32 2.0, %v745_v61 }
 0x73c   :  { %1338 = vmatprep.subr.bf16.mxu1 %v1437_v0 }
 0x73d   :  { %v797_v4 = vmul.f32 %v795_v63, %v793_v5 }
 0x73f   :  { %1339 = vmatpush3.bf16.msra.mxu1 %v1502_v6  ;;  %v803_v13 = vrot.slane %v797_v4, 7 }
 0x740   :  { %1340 = vmatprep.subr.bf16.mxu1 %v1437_v0 }
 0x743   :  { %1341 = vmatpush3.bf16.msra.mxu1 %v1508_v7  ;;  %v812_v7 = vrot.slane %v810_v10, 7 }
 0x744   :  { %1342 = vmatprep.subr.bf16.mxu1 %v1437_v0 }
 0x747   :  { %1343 = vmatpush3.bf16.msra.mxu1 %v1514_v8 }
 0x748   :  { %1344 = vmatprep.subr.bf16.mxu1 %v1437_v0 }
 0x74b   :  { %1345 = vmatpush3.bf16.msra.mxu1 %v1520_v9 }
 0x801   :  { %v781_v6 = vpop.f32.mrb[12].mxu1 }
 0x802   :  { %v787_v11 = vmul.f32 0.000390625, %v781_v6  ;;  %v1308_v14 = vpop.f32.mrb[13].mxu1 }
 0x803   :  { %v784_v8 = vpop.f32.mrb[14].mxu1 }
 0x804   :  { %v800_v16 = vmul.f32 %v799_v12, %v787_v11  ;;  %v805_v0 = vmul.f32 %v803_v13, %v787_v11  ;;  %v814_v17 = vmul.f32 %v812_v7, %v787_v11  ;;  %v816_v9 = vmul.f32 %v797_v4, %v787_v11  ;;  %v1309_v18 = vpop.f32.mrb[15].mxu1 }
 0x806   :  { %v801_v20 = vadd.f32 %v800_v16, %v798_v15  ;;  %v807_v21 = vrot.slane %v805_v0, 1  ;;  %v815_v22 = vadd.f32 %v814_v17, %v798_v15  ;;  %v818_v23 = vrot.slane %v816_v9, 7 }
 0x808   :  { %v809_v24 = vsub.f32 %v801_v20, %v807_v21  ;;  %v820_v25 = vsub.f32 %v815_v22, %v818_v23 }
 0x80a   :  { %v822_v26 = vmul.f32 %v820_v25, %v820_v25  ;;  %v821_v27 = vmul.f32 %v809_v24, %v809_v24 }
 0x80c   :  { %v824_v28 = vrot.slane %v822_v26, 1 }
 0x80e   :  { %v826_v29 = vadd.f32 %v824_v28, %v821_v27 }
 0x810   :  { %1378 = vrsqrt.f32 %v826_v29 }
 0x81a   :  { %v1379_v30 = vpop.eup %1378 }
 0x81b   :  { %v828_v31 = vmul.f32 0.999, %v1379_v30 }
 0x81d   :  { %v829_v32 = vmin.f32 %v828_v31, 1.0 }
 0x81f   :  { %v830_v33 = vmul.f32 %v829_v32, %v809_v24  ;;  %v833_v34 = vrot.slane %v829_v32, 7 }
 0x821   :  { %v835_v35 = vmul.f32 %v833_v34, %v820_v25  ;;  %831 = vst [vmem:[#allocation6] sm:$0x1] %v830_v33 }
 0x823   :  { %836 = vst [vmem:[#allocation6] sm:$0x2] %v835_v35 }
 0x82a   :  { %v837_v36 = vld [vmem:[#allocation6] sm:$0x3] }
 0x82b   :  { %v838_v37 = vpack.c.bf16 %v837_v36, %v837_v36  ;;  %v880_v38 = vmul.f32 %v837_v36, %v837_v36  ;;  %v885_v41 = vmul.f32 2.0, %v837_v36  ;;  %v887_v42 = vrot.slane %v837_v36, 1 }
 0x82c   :  { %v890_v51 = vmul.f32 %v837_v36, %v1550_v19 }
 0x82d   :  { %1327 = vmatmul.mubr.bf16.vlgmr.msra.gmra.mrb[16].mxu0 %v838_v37  ;;  %v882_v39 = vrot.slane %v880_v38, 1  ;;  %v889_v43 = vmul.f32 %v887_v42, %v885_v41 }
 0x82f   :  { %v884_v40 = vsub.f32 %v880_v38, %v882_v39  ;;  %v895_v48 = vrot.slane %v889_v43, 7 }
 0x831   :  { %v902_v44 = vadd.f32 1.0, %v884_v40  ;;  %v891_v47 = vsub.f32 1.0, %v884_v40 }
 0x833   :  { %v904_v49 = vrot.slane %v902_v44, 7 }
 0x900   :  { %v873_v45 = vpop.f32.mrb[16].mxu0 }
 0x901   :  { %v879_v46 = vmul.f32 0.000390625, %v873_v45  ;;  %v1328_v50 = vpop.f32.mrb[17].mxu0 }
 0x902   :  { %v876_v52 = vpop.f32.mrb[18].mxu0 }
 0x903   :  { %v892_v53 = vmul.f32 %v891_v47, %v879_v46  ;;  %v897_v54 = vmul.f32 %v895_v48, %v879_v46  ;;  %v906_v55 = vmul.f32 %v904_v49, %v879_v46  ;;  %v908_v56 = vmul.f32 %v889_v43, %v879_v46  ;;  %v1329_v57 = vpop.f32.mrb[19].mxu0 }
 0x905   :  { %v893_v58 = vadd.f32 %v892_v53, %v890_v51  ;;  %v899_v59 = vrot.slane %v897_v54, 1  ;;  %v907_v60 = vadd.f32 %v906_v55, %v890_v51  ;;  %v910_v61 = vrot.slane %v908_v56, 7 }
 0x907   :  { %v901_v62 = vsub.f32 %v893_v58, %v899_v59  ;;  %v912_v1 = vsub.f32 %v907_v60, %v910_v61 }
 0x909   :  { %v914_v2 = vmul.f32 %v912_v1, %v912_v1  ;;  %v913_v3 = vmul.f32 %v901_v62, %v901_v62 }
 0x90b   :  { %v916_v5 = vrot.slane %v914_v2, 1 }
 0x90d   :  { %v918_v63 = vadd.f32 %v916_v5, %v913_v3 }
 0x90f   :  { %1380 = vrsqrt.f32 %v918_v63 }
 0x919   :  { %v1381_v4 = vpop.eup %1380 }
 0x91a   :  { %v920_v10 = vmul.f32 0.999, %v1381_v4 }
 0x91c   :  { %v921_v6 = vmin.f32 %v920_v10, 1.0 }
 0x91e   :  { %v922_v11 = vmul.f32 %v921_v6, %v901_v62  ;;  %v925_v12 = vrot.slane %v921_v6, 7 }
 0x920   :  { %v927_v13 = vmul.f32 %v925_v12, %v912_v1  ;;  %923 = vst [vmem:[#allocation6] sm:$0x1] %v922_v11 }
 0x922   :  { %928 = vst [vmem:[#allocation6] sm:$0x2] %v927_v13 }
 0x929   :  { %v929_v7 = vld [vmem:[#allocation6] sm:$0x3] }
 0x92a   :  { %v930_v14 = vpack.c.bf16 %v929_v7, %v929_v7  ;;  %v972_v15 = vmul.f32 %v929_v7, %v929_v7  ;;  %v977_v0 = vmul.f32 2.0, %v929_v7  ;;  %v979_v17 = vrot.slane %v929_v7, 1 }
 0x92b   :  { %v982_v26 = vmul.f32 %v929_v7, %v1550_v19 }
 0x92c   :  { %1347 = vmatmul.mubr.bf16.vlgmr.msra.gmra.mrb[16].mxu1 %v930_v14  ;;  %v974_v8 = vrot.slane %v972_v15, 1  ;;  %v981_v9 = vmul.f32 %v979_v17, %v977_v0 }
 0x92e   :  { %v976_v16 = vsub.f32 %v972_v15, %v974_v8  ;;  %v987_v23 = vrot.slane %v981_v9, 7 }
 0x930   :  { %v994_v18 = vadd.f32 1.0, %v976_v16  ;;  %v983_v22 = vsub.f32 1.0, %v976_v16 }
 0x932   :  { %v996_v24 = vrot.slane %v994_v18, 7 }
 0x9ff   :  { %v965_v20 = vpop.f32.mrb[16].mxu1 }
 0xa00   :  { %v971_v21 = vmul.f32 0.000390625, %v965_v20  ;;  %v1348_v25 = vpop.f32.mrb[17].mxu1 }
 0xa01   :  { %v968_v27 = vpop.f32.mrb[18].mxu1 }
 0xa02   :  { %v984_v28 = vmul.f32 %v983_v22, %v971_v21  ;;  %v989_v29 = vmul.f32 %v987_v23, %v971_v21  ;;  %v998_v30 = vmul.f32 %v996_v24, %v971_v21  ;;  %v1000_v31 = vmul.f32 %v981_v9, %v971_v21  ;;  %v1349_v32 = vpop.f32.mrb[19].mxu1 }
 0xa04   :  { %v985_v33 = vadd.f32 %v984_v28, %v982_v26  ;;  %v991_v34 = vrot.slane %v989_v29, 1  ;;  %v999_v35 = vadd.f32 %v998_v30, %v982_v26  ;;  %v1002_v36 = vrot.slane %v1000_v31, 7 }
 0xa06   :  { %v993_v37 = vsub.f32 %v985_v33, %v991_v34  ;;  %v1004_v38 = vsub.f32 %v999_v35, %v1002_v36 }
 0xa08   :  { %v1006_v39 = vmul.f32 %v1004_v38, %v1004_v38  ;;  %v1005_v40 = vmul.f32 %v993_v37, %v993_v37 }
 0xa0a   :  { %v1008_v41 = vrot.slane %v1006_v39, 1 }
 0xa0c   :  { %v1010_v42 = vadd.f32 %v1008_v41, %v1005_v40 }
 0xa0e   :  { %1382 = vrsqrt.f32 %v1010_v42 }
 0xa18   :  { %v1383_v43 = vpop.eup %1382 }
 0xa19   :  { %v1012_v44 = vmul.f32 0.999, %v1383_v43 }
 0xa1b   :  { %v1013_v19 = vmin.f32 %v1012_v44, 1.0 }
 0xa1d   :  { %v1014_v45 = vmul.f32 %v1013_v19, %v993_v37  ;;  %v1017_v46 = vrot.slane %v1013_v19, 7 }
 0xa1f   :  { %v1019_v47 = vmul.f32 %v1017_v46, %v1004_v38  ;;  %1015 = vst [vmem:[#allocation6] sm:$0x1] %v1014_v45 }
 0xa21   :  { %1020 = vst [vmem:[#allocation6] sm:$0x2] %v1019_v47 }
 0xa28   :  { %v1021_v48 = vld [vmem:[#allocation6] sm:$0x3] }
 0xa29   :  { %v1022_v49 = vmul.f32 %v1021_v48, %v1021_v48 }
 0xa2b   :  { %v1024_v50 = vrot.slane %v1022_v49, 1 }
 0xa2d   :  { %v1026_v51 = vadd.f32 %v1024_v50, %v1022_v49 }
 0xa2f   :  { %1384 = vrsqrt.f32 %v1026_v51 }
 0xa39   :  { %v1385_v52 = vpop.eup %1384 }
 0xa3a   :  { %v1028_v53 = vmul.f32 0.999, %v1385_v52 }
 0xa3c   :  { %v1029_v54 = vmin.f32 %v1028_v53, 1.0 }
 0xa3e   :  { %v1030_v55 = vmul.f32 %v1029_v54, %v1021_v48  ;;  %v1033_v56 = vrot.slane %v1029_v54, 7 }
 0xa40   :  { %1031 = vst [vmem:[#allocation6] sm:$0x1] %v1030_v55  ;;  %v1035_v57 = vmul.f32 %v1033_v56, %v1021_v48 }
 0xa42   :  { %1036 = vst [vmem:[#allocation6] sm:$0x2] %v1035_v57 }
 0xa43   :  { %1419 = shalt.err (!%p1416_p12)
}
 0xa44   :  { %s1420_s7 = scalar_lea.hbm %s1701_s3, 32 }
 0xa45   :  { %p1421_p13 = scmp.ne.s32.totalorder %s1701_s3, %s1420_s7  ;;  %p1424_p0 = scmp.lt.u32.totalorder %s1420_s7, %s1701_s3 }
 0xa47   :  { %p1426_p1 = pnand %p1424_p0, %p1421_p13 }
 0xa49   :  { %1429 = shalt.err (!%p1426_p1)
}
 0xa4a   :  { %1046 = dma.vmem_to_hbm [thread:$0]  %s1044_s30, 32, %s1701_s3, [#allocation5]  }
 0xa4b   :  { %1432 = dma.done.wait [#allocation5], 32  }
 0xa4c   :  { %1433 = vsyncadd [#allocation5], 4294967264 }
 0xa4d   :  { %1050 = vsyncpa [#allocation4], 1 }
 0xa4e   :  { %1051 = vsyncpa [#allocation5], 1 }

</bundles_post_ra>
